<compile_context>
chip_gen: v5e
topology: v5e:2x2
jax: 0.10.0
libtpu: 0.0.40
codegen_flags: <defaults>
</compile_context>

<pallas_src>
import functools
from typing import NamedTuple

import numpy as np
import jax
import jax.numpy as jnp
from jax.experimental import pallas as pl
from jax.experimental.pallas import tpu as pltpu

BN_EPS = 1e-3                       # torchvision EfficientNetV2 uses BatchNorm2d(eps=1e-3)
VMEM_LIMIT = 48 * 1024 * 1024       # <= v7x 64 MiB physical VMEM


# ---------------------------------------------------------------------------
# small helpers
# ---------------------------------------------------------------------------
def _ru(x, m):
    return ((x + m - 1) // m) * m


def _pick_tile(dim, cap, mult):
    """Tile size (multiple of `mult`, <= cap) minimizing padding of `dim`."""
    if dim <= cap:
        return _ru(dim, mult)
    best, best_pad = mult, _ru(dim, mult)
    for t in range(cap, mult - 1, -mult):
        p = _ru(dim, t)
        if p < best_pad or (p == best_pad and t > best):
            best, best_pad = t, p
    return best


def _pick_div(n, cands=(512, 256, 128)):
    for c in cands:
        if n % c == 0:
            return c
    return 128


def _apply_act(y, act):
    if act == "silu":
        return y * jax.nn.sigmoid(y)
    if act == "relu":
        return jnp.maximum(y, 0.0)
    if act == "sigmoid":
        return jax.nn.sigmoid(y)
    return y


# ---------------------------------------------------------------------------
# Pallas kernel 1: generic tiled GEMM with fused epilogues
#   out[b] = act( (x[b] * scale[b]) @ w + bias ) + res[b]
# ---------------------------------------------------------------------------
@functools.lru_cache(maxsize=None)
def _gemm_fn(B, Mp, Kp, Np, tm, tk, tn, act, has_scale, has_res):
    nmt, nnt, nkt = Mp // tm, Np // tn, Kp // tk

    def kernel(*refs):
        i = 0
        x_ref = refs[i]; i += 1
        s_ref = None
        if has_scale:
            s_ref = refs[i]; i += 1
        w_ref = refs[i]; i += 1
        b_ref = refs[i]; i += 1
        r_ref = None
        if has_res:
            r_ref = refs[i]; i += 1
        o_ref = refs[i]; i += 1
        acc_ref = refs[i]

        @pl.when(pl.program_id(3) == 0)
        def _():
            acc_ref[...] = jnp.zeros_like(acc_ref)

        a = x_ref[...]
        if has_scale:
            a = (a.astype(jnp.float32) * s_ref[...]).astype(jnp.bfloat16)
        acc_ref[...] += jnp.dot(a, w_ref[...], preferred_element_type=jnp.float32)

        @pl.when(pl.program_id(3) == nkt - 1)
        def _():
            y = _apply_act(acc_ref[...] + b_ref[...], act)
            if has_res:
                y = y + r_ref[...]
            o_ref[...] = y

    in_specs = [pl.BlockSpec((None, tm, tk), lambda b, i, j, k: (b, i, k))]
    if has_scale:
        in_specs.append(pl.BlockSpec((None, 1, tk), lambda b, i, j, k: (b, 0, k)))
    in_specs.append(pl.BlockSpec((tk, tn), lambda b, i, j, k: (k, j)))
    in_specs.append(pl.BlockSpec((1, tn), lambda b, i, j, k: (0, j)))
    if has_res:
        in_specs.append(pl.BlockSpec((None, tm, tn), lambda b, i, j, k: (b, i, j)))

    return pl.pallas_call(
        kernel,
        out_shape=jax.ShapeDtypeStruct((B, Mp, Np), jnp.float32),
        grid=(B, nmt, nnt, nkt),
        in_specs=in_specs,
        out_specs=pl.BlockSpec((None, tm, tn), lambda b, i, j, k: (b, i, j)),
        scratch_shapes=[pltpu.VMEM((tm, tn), jnp.float32)],
        compiler_params=pltpu.CompilerParams(
            dimension_semantics=("parallel", "parallel", "parallel", "arbitrary"),
            vmem_limit_bytes=VMEM_LIMIT),
    )


def gemm(x, w, bias, act="none", scale=None, res=None):
    """x:(B,M,K)  w:(K,N)  bias:(N,)  scale:(B,K) or None  res:(B,M,N) or None."""
    B, M, K = x.shape
    K2, N = w.shape
    assert K == K2
    tm = _pick_tile(M, 512, 8)
    tk = _pick_tile(K, 512, 128)
    tn = _pick_tile(N, 512, 128)
    Mp, Kp, Np = _ru(M, tm), _ru(K, tk), _ru(N, tn)

    xp = jnp.pad(x.astype(jnp.float32), ((0, 0), (0, Mp - M), (0, Kp - K))).astype(jnp.bfloat16)
    wp = jnp.pad(w.astype(jnp.float32), ((0, Kp - K), (0, Np - N))).astype(jnp.bfloat16)
    bp = jnp.pad(bias.astype(jnp.float32), (0, Np - N)).reshape(1, Np)

    args = [xp]
    if scale is not None:
        sp = jnp.pad(scale.astype(jnp.float32).reshape(B, 1, K), ((0, 0), (0, 0), (0, Kp - K)))
        args.append(sp)
    args += [wp, bp]
    if res is not None:
        rp = jnp.pad(res.astype(jnp.float32), ((0, 0), (0, Mp - M), (0, Np - N)))
        args.append(rp)

    fn = _gemm_fn(int(B), int(Mp), int(Kp), int(Np), int(tm), int(tk), int(tn),
                  act, scale is not None, res is not None)
    y = fn(*args)
    return y[:, :M, :N]


# ---------------------------------------------------------------------------
# Pallas kernel 2: im2col-free 3x3 stride-1 conv (+BN bias + act [+ residual])
# ---------------------------------------------------------------------------
@functools.lru_cache(maxsize=None)
def _conv3x3_fn(Nb, H, W, Cinp, Coutp, tn, act, has_res):
    Hp, Wp = H + 2, W + 2
    M = H * W

    def kernel(*refs):
        if has_res:
            x_ref, w_ref, b_ref, r_ref, o_ref = refs
        else:
            x_ref, w_ref, b_ref, o_ref = refs
            r_ref = None
        x = x_ref[...]                                   # (Hp, Wp, Cinp) f32
        acc = jnp.zeros((M, tn), jnp.float32)
        for dh in range(3):
            for dw in range(3):
                a = x[dh:dh + H, dw:dw + W, :].reshape(M, Cinp).astype(jnp.bfloat16)
                acc = acc + jnp.dot(a, w_ref[dh, dw], preferred_element_type=jnp.float32)
        y = _apply_act(acc + b_ref[...], act)
        if has_res:
            y = y + r_ref[...]
        o_ref[...] = y

    in_specs = [pl.BlockSpec((None, Hp, Wp, Cinp), lambda b, j: (b, 0, 0, 0)),
                pl.BlockSpec((3, 3, Cinp, tn), lambda b, j: (0, 0, 0, j)),
                pl.BlockSpec((1, tn), lambda b, j: (0, j))]
    if has_res:
        in_specs.append(pl.BlockSpec((None, M, tn), lambda b, j: (b, 0, j)))

    return pl.pallas_call(
        kernel,
        out_shape=jax.ShapeDtypeStruct((Nb, M, Coutp), jnp.float32),
        grid=(Nb, Coutp // tn),
        in_specs=in_specs,
        out_specs=pl.BlockSpec((None, M, tn), lambda b, j: (b, 0, j)),
        compiler_params=pltpu.CompilerParams(
            dimension_semantics=("parallel", "parallel"),
            vmem_limit_bytes=VMEM_LIMIT),
    )


def _conv3x3_bn_act(x, wf4, beta, act, res_flat=None):
    """x:(Nb,H,W,Cin) ; wf4:(3,3,Cin,Cout) BN-folded ; res_flat:(Nb,H*W,Cout) or None."""
    Nb, H, W, Cin = x.shape
    Cout = wf4.shape[-1]
    Cinp, Coutp = _ru(Cin, 128), _ru(Cout, 128)
    tn = _pick_div(Coutp)
    xp = jnp.pad(x.astype(jnp.float32), ((0, 0), (1, 1), (1, 1), (0, Cinp - Cin)))
    wp = jnp.pad(wf4.astype(jnp.float32),
                 ((0, 0), (0, 0), (0, Cinp - Cin), (0, Coutp - Cout))).astype(jnp.bfloat16)
    bp = jnp.pad(beta.astype(jnp.float32), (0, Coutp - Cout)).reshape(1, Coutp)
    args = [xp, wp, bp]
    if res_flat is not None:
        args.append(jnp.pad(res_flat.astype(jnp.float32), ((0, 0), (0, 0), (0, Coutp - Cout))))
    y = _conv3x3_fn(int(Nb), int(H), int(W), int(Cinp), int(Coutp), int(tn),
                    act, res_flat is not None)(*args)
    return y[:, :, :Cout].reshape(Nb, H, W, Cout)


# ---------------------------------------------------------------------------
# Pallas kernel 3: depthwise 3x3 conv + BN + SiLU, fused SE global-avg-pool
# ---------------------------------------------------------------------------
@functools.lru_cache(maxsize=None)
def _dwconv_fn(Nb, H, W, Cp, tc):
    Hp, Wp = H + 2, W + 2

    def kernel(x_ref, w_ref, b_ref, o_ref, p_ref):
        x = x_ref[...]                                   # (Hp, Wp, tc) f32
        acc = jnp.zeros((H, W, tc), jnp.float32)
        for dh in range(3):
            for dw in range(3):
                tap = jnp.reshape(w_ref[dh, dw, :], (1, 1, tc))
                acc = acc + x[dh:dh + H, dw:dw + W, :] * tap
        y = acc + b_ref[...].reshape(1, 1, tc)
        y = y * jax.nn.sigmoid(y)                        # SiLU
        o_ref[...] = y
        p_ref[...] = jnp.mean(y, axis=(0, 1)).reshape(1, tc)

    return pl.pallas_call(
        kernel,
        out_shape=(jax.ShapeDtypeStruct((Nb, H, W, Cp), jnp.float32),
                   jax.ShapeDtypeStruct((Nb, 1, Cp), jnp.float32)),
        grid=(Nb, Cp // tc),
        in_specs=[pl.BlockSpec((None, Hp, Wp, tc), lambda b, c: (b, 0, 0, c)),
                  pl.BlockSpec((3, 3, tc), lambda b, c: (0, 0, c)),
                  pl.BlockSpec((1, tc), lambda b, c: (0, c))],
        out_specs=[pl.BlockSpec((None, H, W, tc), lambda b, c: (b, 0, 0, c)),
                   pl.BlockSpec((None, 1, tc), lambda b, c: (b, 0, c))],
        compiler_params=pltpu.CompilerParams(
            dimension_semantics=("parallel", "parallel"),
            vmem_limit_bytes=VMEM_LIMIT),
    )


def dwconv_bn_silu_pool(x, w, gamma, beta, stride):
    """Depthwise 3x3 (groups=C) + eval-BN (folded) + SiLU; also returns the SE avg-pool."""
    Nb, H, W, C = x.shape
    # TODO(synk): kernel assumes 3x3 depthwise (true for every EfficientNet-V2-L block).
    bn_s = gamma / jnp.sqrt(1.0 + BN_EPS)
    wk = jnp.transpose(w[:, 0], (1, 2, 0)) * bn_s                     # (3,3,C)
    Cp = _ru(C, 128)
    tc = _pick_div(Cp)
    xp = jnp.pad(x.astype(jnp.float32), ((0, 0), (1, 1), (1, 1), (0, Cp - C)))
    wkp = jnp.pad(wk.astype(jnp.float32), ((0, 0), (0, 0), (0, Cp - C)))
    bpad = jnp.pad(beta.astype(jnp.float32), (0, Cp - C)).reshape(1, Cp)
    y, pooled = _dwconv_fn(int(Nb), int(H), int(W), int(Cp), int(tc))(xp, wkp, bpad)
    y = y[..., :C]
    pooled = pooled[..., :C]
    if stride == 2:
        # TODO(synk): stride-2 depthwise is stride-1 + subsample (only 2 blocks in V2-L).
        y = y[:, ::2, ::2, :]
        pooled = jnp.mean(y, axis=(1, 2), keepdims=True)
    return y, pooled


# ---------------------------------------------------------------------------
# layer wrappers (JAX glue, runs inside the per-block jit)
# ---------------------------------------------------------------------------
def _im2col(x, k, stride, pad):
    Nb, H, W, C = x.shape
    Ho = (H + 2 * pad - k) // stride + 1
    Wo = (W + 2 * pad - k) // stride + 1
    xp = jnp.pad(x, ((0, 0), (pad, pad), (pad, pad), (0, 0)))
    cols = []
    for dh in range(k):
        for dw in range(k):
            cols.append(xp[:, dh:dh + stride * Ho:stride, dw:dw + stride * Wo:stride, :])
    patches = jnp.stack(cols, axis=3)                     # (N, Ho, Wo, k*k, C)
    return patches.reshape(Nb * Ho * Wo, k * k * C), (Nb, Ho, Wo)


def conv_bn_act(x, w, gamma, beta, stride, act, res=None):
    """Conv2d(bias=False) + eval BatchNorm (folded) + act [+ residual].  w:(Cout,Cin,k,k)."""
    Cout, Cin, k, _ = w.shape
    pad = (k - 1) // 2
    bn_s = gamma / jnp.sqrt(1.0 + BN_EPS)                 # running_mean=0, running_var=1
    wf4 = jnp.transpose(w, (2, 3, 1, 0)) * bn_s           # (k,k,Cin,Cout)
    Nb, H, W, _ = x.shape

    fused_ok = (k == 3 and stride == 1 and W % 8 == 0 and H * W <= 4096
                and _ru(Cin, 128) <= 512
                and (H + 2) * (W + 2) * _ru(Cin, 128) * 4 <= 8 * 1024 * 1024)
    if fused_ok:
        rflat = None if res is None else res.reshape(Nb, H * W, Cout)
        return _conv3x3_bn_act(x, wf4, beta, act, rflat)

    a, (Nb, Ho, Wo) = _im2col(x, k, stride, pad)
    wf = wf4.reshape(k * k * Cin, Cout)
    rflat = None if res is None else res.reshape(1, Nb * Ho * Wo, Cout)
    y = gemm(a[None], wf, beta, act, res=rflat)[0]
    return y.reshape(Nb, Ho, Wo, Cout)


def conv_transpose2x2_act(x, w, b, act):
    """ConvTranspose2d(kernel=2, stride=2) + act.  w:(Cin,Cout,2,2)."""
    Nb, H, W, Cin = x.shape
    Cout = w.shape[1]
    wf = jnp.transpose(w, (0, 2, 3, 1)).reshape(Cin, 4 * Cout)   # cols ordered (di,dj,co)
    bf = jnp.tile(b, 4)
    y = gemm(x.reshape(1, Nb * H * W, Cin), wf, bf, act)[0]
    # TODO(synk): pixel-shuffle interleave done by XLA transpose (fused inside the jit).
    y = y.reshape(Nb, H, W, 2, 2, Cout).transpose(0, 1, 3, 2, 4, 5)
    return y.reshape(Nb, 2 * H, 2 * W, Cout)


def final_conv1x1(x, w, b):
    Nb, H, W, Cin = x.shape
    ncls = w.shape[0]
    wf = w.reshape(ncls, Cin).T
    y = gemm(x.reshape(1, Nb * H * W, Cin), wf, b, "none")[0]    # N padded to 128 (lane-dense)
    return y.reshape(Nb, H, W, ncls)


# ---------------------------------------------------------------------------
# EfficientNet-V2-L architecture (torchvision config) + U-Net style decoder
# ---------------------------------------------------------------------------
STAGE_CFG = [
    # (block_type, expand_ratio, kernel, stride, in_ch, out_ch, num_layers)
    ("fused", 1, 3, 1, 32, 32, 4),
    ("fused", 4, 3, 2, 32, 64, 7),
    ("fused", 4, 3, 2, 64, 96, 7),
    ("mb",    4, 3, 2, 96, 192, 10),
    ("mb",    6, 3, 1, 192, 224, 19),
    ("mb",    6, 3, 2, 224, 384, 25),
    ("mb",    6, 3, 1, 384, 640, 7),
]
LAST_CHANNEL = 1280
DECODER_CFG = [(1280, 512), (512, 256), (256, 128), (128, 64), (64, 32)]


class BlockMeta(NamedTuple):
    type: str
    e: int
    k: int
    stride: int
    cin: int
    cout: int


def _block_metas():
    metas = []
    for (btype, e, k, s, cin, cout, n) in STAGE_CFG:
        for i in range(n):
            ic = cin if i == 0 else cout
            st = s if i == 0 else 1
            t = "fused1" if (btype == "fused" and e == 1) else btype
            metas.append(BlockMeta(t, e, k, st, ic, cout))
    return tuple(metas)


BLOCK_METAS = _block_metas()


class ParamGen:
    def __init__(self, key):
        self._key = key

    def _next(self):
        self._key, sub = jax.random.split(self._key)
        return sub

    def conv(self, cout, cin, k, gain=2.0):
        std = float(np.sqrt(gain / (cin * k * k)))
        return jax.random.normal(self._next(), (cout, cin, k, k), jnp.float32) * std

    def dwconv(self, c, k):
        std = float(np.sqrt(2.0 / (k * k)))
        return jax.random.normal(self._next(), (c, 1, k, k), jnp.float32) * std

    def convT(self, cin, cout, k):
        std = float(np.sqrt(1.0 / (cin * k * k)))
        return jax.random.normal(self._next(), (cin, cout, k, k), jnp.float32) * std

    def bn(self, c):
        return jnp.ones((c,), jnp.float32), jnp.zeros((c,), jnp.float32)

    def bias(self, c):
        return jnp.zeros((c,), jnp.float32)


def build_params(key, n_classes=1):
    g = ParamGen(key)
    params = {}
    sg, sb = g.bn(32)
    params["stem"] = dict(w=g.conv(32, 3, 3), g=sg, b=sb)

    blocks = []
    for m in BLOCK_METAS:
        ic, cout, k, e = m.cin, m.cout, m.k, m.e
        exp = ic * e
        if m.type == "fused1":
            g1, b1 = g.bn(cout)
            bp = dict(w=g.conv(cout, ic, k), g=g1, b=b1)
        elif m.type == "fused":
            eg, eb = g.bn(exp)
            pgm, pb = g.bn(cout)
            bp = dict(ew=g.conv(exp, ic, k), eg=eg, eb=eb,
                      pw=g.conv(cout, exp, 1, gain=1.0), pg=pgm, pb=pb)
        else:  # MBConv
            sq = max(1, ic // 4)
            eg, eb = g.bn(exp)
            dg, db = g.bn(exp)
            pgm, pb = g.bn(cout)
            bp = dict(ew=g.conv(exp, ic, 1), eg=eg, eb=eb,
                      dw=g.dwconv(exp, k), dg=dg, db=db,
                      sw1=g.conv(sq, exp, 1, gain=1.0), sb1=g.bias(sq),
                      sw2=g.conv(exp, sq, 1, gain=1.0), sb2=g.bias(exp),
                      pw=g.conv(cout, exp, 1, gain=1.0), pg=pgm, pb=pb)
        blocks.append(bp)
    params["blocks"] = blocks

    hg, hb = g.bn(LAST_CHANNEL)
    params["head"] = dict(w=g.conv(LAST_CHANNEL, 640, 1), g=hg, b=hb)
    params["decoder"] = [dict(w=g.convT(ci, co, 2), b=g.bias(co)) for ci, co in DECODER_CFG]
    params["final"] = dict(w=g.conv(n_classes, 32, 1, gain=1.0), b=g.bias(n_classes))
    return params


# ---------------------------------------------------------------------------
# blocks / forward (jit at block granularity; identical blocks share compiles)
# ---------------------------------------------------------------------------
def _run_block(x, bp, meta):
    has_res = (meta.stride == 1 and meta.cin == meta.cout)
    res = x if has_res else None                          # StochasticDepth == identity (eval)

    if meta.type == "fused1":
        return conv_bn_act(x, bp["w"], bp["g"], bp["b"], meta.stride, "silu", res=res)

    if meta.type == "fused":
        h = conv_bn_act(x, bp["ew"], bp["eg"], bp["eb"], meta.stride, "silu")
        return conv_bn_act(h, bp["pw"], bp["pg"], bp["pb"], 1, "none", res=res)

    # ---- MBConv: expand 1x1 -> dw3x3(+pool) -> SE FCs -> fused scale+project+residual ----
    Nb, H, W, _ = x.shape
    h = conv_bn_act(x, bp["ew"], bp["eg"], bp["eb"], 1, "silu")
    h, pooled = dwconv_bn_silu_pool(h, bp["dw"], bp["dg"], bp["db"], meta.stride)
    _, Ho, Wo, Cexp = h.shape

    csq = bp["sb1"].shape[0]
    w1 = bp["sw1"].reshape(csq, Cexp).T                    # (Cexp, Csq)
    w2 = bp["sw2"].reshape(Cexp, csq).T                    # (Csq, Cexp)
    s = gemm(pooled.reshape(1, Nb, Cexp), w1, bp["sb1"], "silu")[0]      # (Nb, Csq)
    s = gemm(s[None], w2, bp["sb2"], "sigmoid")[0]                       # (Nb, Cexp)

    bn_s = bp["pg"] / jnp.sqrt(1.0 + BN_EPS)
    wproj = bp["pw"].reshape(meta.cout, Cexp).T * bn_s                   # (Cexp, Cout)
    res_flat = x.reshape(Nb, H * W, meta.cout) if has_res else None
    y = gemm(h.reshape(Nb, Ho * Wo, Cexp), wproj, bp["pb"], "none",
             scale=s, res=res_flat)
    return y.reshape(Nb, Ho, Wo, meta.cout)


_run_block_jit = functools.partial(jax.jit, static_argnums=(2,))(_run_block)


@jax.jit
def _stem_jit(x_nchw, p):
    # layout: NCHW at the API boundary; NHWC (channels on TPU lanes) inside.
    x = jnp.transpose(x_nchw, (0, 2, 3, 1)).astype(jnp.float32)
    return conv_bn_act(x, p["w"], p["g"], p["b"], 2, "silu")


@jax.jit
def _head_jit(x, p):
    return conv_bn_act(x, p["w"], p["g"], p["b"], 1, "silu")


@jax.jit
def _decoder_jit(x, dp):
    return conv_transpose2x2_act(x, dp["w"], dp["b"], "relu")


@jax.jit
def _final_jit(x, p):
    y = final_conv1x1(x, p["w"], p["b"])
    return jnp.transpose(y, (0, 3, 1, 2))                 # back to NCHW


def efficientnet_unet_forward(x_nchw, params):
    x = _stem_jit(x_nchw, params["stem"])
    for bp, meta in zip(params["blocks"], BLOCK_METAS):
        x = _run_block_jit(x, bp, meta)
    x = _head_jit(x, params["head"])                      # encoder features (C=1280)
    for dp in params["decoder"]:
        x = _decoder_jit(x, dp)                           # ConvTranspose2d + ReLU
    return _final_jit(x, params["final"])


if __name__ == "__main__":
    root = jax.random.PRNGKey(0)
    kparam, kx = jax.random.split(root)
    params = build_params(kparam, n_classes=1)

    # small input: batch=2, RGB, 32x32 (encoder downsamples x32 -> 1x1x1280 features)
    x = jax.random.normal(kx, (2, 3, 32, 32), jnp.float32)

    out = efficientnet_unet_forward(x, params)
    out = jax.block_until_ready(out)

    assert out.shape == (2, 1, 32, 32), out.shape
    assert bool(jnp.all(jnp.isfinite(out)))
    print("KERNEL_OK")
</pallas_src>

<mosaic_0001>
module attributes {stable_mosaic.version = 11 : i64} {
  func.func @kernel(%arg0: i32, %arg1: i32, %arg2: i32, %arg3: i32, %arg4: memref<1x512x128xbf16, #tpu.memory_space<vmem>>, %arg5: memref<128x128xbf16, #tpu.memory_space<vmem>>, %arg6: memref<1x128xf32, #tpu.memory_space<vmem>>, %arg7: memref<1x512x128xf32, #tpu.memory_space<vmem>>, %arg8: memref<512x128xf32, #tpu.memory_space<vmem>>) attributes {dimension_semantics = [#tpu.dimension_semantics<parallel>, #tpu.dimension_semantics<parallel>, #tpu.dimension_semantics<parallel>, #tpu.dimension_semantics<arbitrary>], iteration_bounds = array<i64: 1, 1, 1, 1>, scalar_prefetch = 0 : i64, scratch_operands = 1 : i64, tpu.core_type = #tpu.core_type<tc>, window_params = [{transform_indices = @transform_0, window_bounds = array<i64: 1, 512, 128>}, {transform_indices = @transform_1, window_bounds = array<i64: 128, 128>}, {transform_indices = @transform_2, window_bounds = array<i64: 1, 128>}, {transform_indices = @transform_3, window_bounds = array<i64: 1, 512, 128>}]} {
    %c0_i32 = arith.constant 0 : i32
    %0 = arith.cmpi eq, %arg3, %c0_i32 : i32
    %1 = arith.extui %0 : i1 to i32
    %c0_i32_0 = arith.constant 0 : i32
    %2 = arith.cmpi ne, %1, %c0_i32_0 : i32
    scf.if %2 {
      %cst_11 = arith.constant 0.000000e+00 : f32
      %13 = vector.broadcast %cst_11 : f32 to vector<512x128xf32>
      %c0_12 = arith.constant 0 : index
      %c0_13 = arith.constant 0 : index
      %14 = vector.load %arg8[%c0_12, %c0_13] : memref<512x128xf32, #tpu.memory_space<vmem>>, vector<512x128xf32>
      tpu.vector_store %arg8[%c0_12, %c0_13], %13 {strides = array<i32>} : memref<512x128xf32, #tpu.memory_space<vmem>>, vector<512x128xf32>,
    } else {
    }
    %c0 = arith.constant 0 : index
    %c0_1 = arith.constant 0 : index
    %c0_2 = arith.constant 0 : index
    %3 = vector.load %arg4[%c0, %c0_1, %c0_2] : memref<1x512x128xbf16, #tpu.memory_space<vmem>>, vector<1x512x128xbf16>
    %4 = vector.shape_cast %3 : vector<1x512x128xbf16> to vector<512x128xbf16>
    %c0_3 = arith.constant 0 : index
    %c0_4 = arith.constant 0 : index
    %5 = vector.load %arg8[%c0_3, %c0_4] : memref<512x128xf32, #tpu.memory_space<vmem>>, vector<512x128xf32>
    %c0_5 = arith.constant 0 : index
    %c0_6 = arith.constant 0 : index
    %6 = vector.load %arg5[%c0_5, %c0_6] : memref<128x128xbf16, #tpu.memory_space<vmem>>, vector<128x128xbf16>
    %cst = arith.constant dense<0.000000e+00> : vector<512x128xf32>
    %7 = tpu.matmul %4, %6, %cst {dimension_numbers = #tpu.dot_dimension_numbers<[1], [0], [0], [1], [0, 0, 1, 1], [], []>} : vector<512x128xbf16>, vector<128x128xbf16>, vector<512x128xf32> -> vector<512x128xf32>
    %8 = arith.addf %5, %7 : vector<512x128xf32>
    %c0_7 = arith.constant 0 : index
    %c0_8 = arith.constant 0 : index
    %9 = vector.load %arg8[%c0_7, %c0_8] : memref<512x128xf32, #tpu.memory_space<vmem>>, vector<512x128xf32>
    tpu.vector_store %arg8[%c0_7, %c0_8], %8 {strides = array<i32>} : memref<512x128xf32, #tpu.memory_space<vmem>>, vector<512x128xf32>,
    %c0_i32_9 = arith.constant 0 : i32
    %10 = arith.cmpi eq, %arg3, %c0_i32_9 : i32
    %11 = arith.extui %10 : i1 to i32
    %c0_i32_10 = arith.constant 0 : i32
    %12 = arith.cmpi ne, %11, %c0_i32_10 : i32
    scf.if %12 {
      %c0_11 = arith.constant 0 : index
      %c0_12 = arith.constant 0 : index
      %13 = vector.load %arg8[%c0_11, %c0_12] : memref<512x128xf32, #tpu.memory_space<vmem>>, vector<512x128xf32>
      %c0_13 = arith.constant 0 : index
      %c0_14 = arith.constant 0 : index
      %14 = vector.load %arg6[%c0_13, %c0_14] : memref<1x128xf32, #tpu.memory_space<vmem>>, vector<1x128xf32>
      %15 = vector.broadcast %14 : vector<1x128xf32> to vector<512x128xf32>
      %16 = arith.addf %13, %15 : vector<512x128xf32>
      %17 = arith.negf %16 : vector<512x128xf32>
      %18 = math.exp %17 : vector<512x128xf32>
      %cst_15 = arith.constant 1.000000e+00 : f32
      %19 = vector.broadcast %cst_15 : f32 to vector<512x128xf32>
      %20 = arith.addf %19, %18 : vector<512x128xf32>
      %21 = arith.divf %19, %20 : vector<512x128xf32>
      %22 = arith.mulf %16, %21 : vector<512x128xf32>
      %c0_16 = arith.constant 0 : index
      %c0_17 = arith.constant 0 : index
      %c0_18 = arith.constant 0 : index
      %23 = vector.load %arg7[%c0_16, %c0_17, %c0_18] : memref<1x512x128xf32, #tpu.memory_space<vmem>>, vector<1x512x128xf32>
      %24 = vector.shape_cast %23 : vector<1x512x128xf32> to vector<512x128xf32>
      %25 = vector.shape_cast %22 : vector<512x128xf32> to vector<1x512x128xf32>
      tpu.vector_store %arg7[%c0_16, %c0_17, %c0_18], %25 {strides = array<i32>} : memref<1x512x128xf32, #tpu.memory_space<vmem>>, vector<1x512x128xf32>,
    } else {
    }
    return
  }
  func.func @transform_0(%arg0: i32, %arg1: i32, %arg2: i32, %arg3: i32) -> (i32, i32, i32) {
    %c0_i32 = arith.constant 0 : i32
    return %arg0, %arg1, %arg3 : i32, i32, i32
  }
  func.func @transform_1(%arg0: i32, %arg1: i32, %arg2: i32, %arg3: i32) -> (i32, i32) {
    %c0_i32 = arith.constant 0 : i32
    return %arg3, %arg2 : i32, i32
  }
  func.func @transform_2(%arg0: i32, %arg1: i32, %arg2: i32, %arg3: i32) -> (i32, i32) {
    %c0_i32 = arith.constant 0 : i32
    %c0_i32_0 = arith.constant 0 : i32
    return %c0_i32, %arg2 : i32, i32
  }
  func.func @transform_3(%arg0: i32, %arg1: i32, %arg2: i32, %arg3: i32) -> (i32, i32, i32) {
    %c0_i32 = arith.constant 0 : i32
    return %arg0, %arg1, %arg2 : i32, i32, i32
  }
}

</mosaic_0001>

<bundles_post_ra>
// kernel: _stem_jit.1
= control target key start
LH: loop header
LB: loop body
LE: loop exit
PB: predicated region body
PF: predicated region fallthrough
CT: control target
= control target key end

     0   :  { %s4198_s0 = inlined_call_operand.vmem [shape: bf16[1,512,128], index: 0, kind: input, shape index: {}]   ;;  %s4199_s1 = inlined_call_operand.vmem [shape: bf16[128,128], index: 1, kind: input, shape index: {}]   ;;  %s4200_s2 = inlined_call_operand.vmem [shape: f32[1,128], index: 2, kind: input, shape index: {}]   ;;  %s4201_s3 = inlined_call_operand.hbm [shape: f32[1,512,128], index: 3, kind: output, shape index: {}]  }
   0x1   :  { %v2524_v0 = vld [vmem:[%s4199_s1 + $0x38] sm:$0xff]  ;;  %v2523_v1 = vld [vmem:[%s4199_s1 + $0x30] sm:$0xff] }
   0x2   :  { %467 = vmatpush.bf16.msra.mxu0 %v2524_v0  ;;  %2525 = vmatpush.bf16.msra.mxu1 %v2524_v0 }
   0x3   :  { %2526 = vmatpush.bf16.msra.mxu2 %v2524_v0  ;;  %2527 = vmatpush.bf16.msra.mxu3 %v2524_v0 }
   0x4   :  { %8 = vsyncpa [#allocation4], 0  ;;  %v2522_v2 = vld [vmem:[%s4199_s1 + $0x28] sm:$0xff]  ;;  %v2521_v3 = vld [vmem:[%s4199_s1 + $0x20] sm:$0xff]  ;;  %s2249_s16 = sshll.u32 %s4201_s3, 4  ;;  %s2838_s17 = smov 128   ;;  %s2250_s16 = int_to_ptr.hbm [resolvable:$true] %s2249_s16 }
   0x5   :  { %v2520_v4 = vld [vmem:[%s4199_s1 + $0x18] sm:$0xff]  ;;  %v2519_v5 = vld [vmem:[%s4199_s1 + $0x10] sm:$0xff]  ;;  %v2518_v6 = vld [vmem:[%s4199_s1 + $0x8] sm:$0xff]  ;;  %s2839_s18 = smov 8  }
   0x6   :  { %468 = vmatpush.bf16.msra.mxu0 %v2523_v1  ;;  %2528 = vmatpush.bf16.msra.mxu1 %v2523_v1  ;;  %v2517_v7 = vld [vmem:[%s4199_s1] sm:$0xff]  ;;  %v2486_v12 = vld [vmem:[%s4198_s0 + $0x8] sm:$0xff]  ;;  %v2487_v16 = vld [vmem:[%s4198_s0 + $0x10] sm:$0xff] }
   0x7   :  { %2529 = vmatpush.bf16.msra.mxu2 %v2523_v1  ;;  %2530 = vmatpush.bf16.msra.mxu3 %v2523_v1  ;;  %v2485_v8 = vld [vmem:[%s4198_s0] sm:$0xff]  ;;  %v2494_v13 = vld [vmem:[%s4198_s0 + $0x48] sm:$0xff]  ;;  %v2495_v17 = vld [vmem:[%s4198_s0 + $0x50] sm:$0xff] }
   0x8   :  { %v2493_v9 = vld [vmem:[%s4198_s0 + $0x40] sm:$0xff]  ;;  %v2502_v14 = vld [vmem:[%s4198_s0 + $0x88] sm:$0xff]  ;;  %v2503_v18 = vld [vmem:[%s4198_s0 + $0x90] sm:$0xff] }
   0x9   :  { %v2501_v10 = vld [vmem:[%s4198_s0 + $0x80] sm:$0xff]  ;;  %v2510_v15 = vld [vmem:[%s4198_s0 + $0xc8] sm:$0xff]  ;;  %v2511_v19 = vld [vmem:[%s4198_s0 + $0xd0] sm:$0xff] }
   0xa   :  { %469 = vmatpush.bf16.msra.mxu0 %v2522_v2  ;;  %2531 = vmatpush.bf16.msra.mxu1 %v2522_v2  ;;  %v2509_v11 = vld [vmem:[%s4198_s0 + $0xc0] sm:$0xff]  ;;  %v2488_v20 = vld [vmem:[%s4198_s0 + $0x18] sm:$0xff]  ;;  %v2490_v28 = vld [vmem:[%s4198_s0 + $0x28] sm:$0xff] }
   0xb   :  { %2532 = vmatpush.bf16.msra.mxu2 %v2522_v2  ;;  %2533 = vmatpush.bf16.msra.mxu3 %v2522_v2  ;;  %v2496_v21 = vld [vmem:[%s4198_s0 + $0x58] sm:$0xff]  ;;  %v2489_v24 = vld [vmem:[%s4198_s0 + $0x20] sm:$0xff]  ;;  %v2498_v29 = vld [vmem:[%s4198_s0 + $0x68] sm:$0xff] }
   0xc   :  { %v2504_v22 = vld [vmem:[%s4198_s0 + $0x98] sm:$0xff]  ;;  %v2497_v25 = vld [vmem:[%s4198_s0 + $0x60] sm:$0xff]  ;;  %v2506_v30 = vld [vmem:[%s4198_s0 + $0xa8] sm:$0xff] }
   0xd   :  { %v2512_v23 = vld [vmem:[%s4198_s0 + $0xd8] sm:$0xff]  ;;  %v2505_v26 = vld [vmem:[%s4198_s0 + $0xa0] sm:$0xff]  ;;  %v2514_v31 = vld [vmem:[%s4198_s0 + $0xe8] sm:$0xff] }
   0xe   :  { %470 = vmatpush.bf16.msra.mxu0 %v2521_v3  ;;  %2534 = vmatpush.bf16.msra.mxu1 %v2521_v3  ;;  %v2513_v27 = vld [vmem:[%s4198_s0 + $0xe0] sm:$0xff]  ;;  %v2491_v32 = vld [vmem:[%s4198_s0 + $0x30] sm:$0xff]  ;;  %v2492_v36 = vld [vmem:[%s4198_s0 + $0x38] sm:$0xff] }
   0xf   :  { %2535 = vmatpush.bf16.msra.mxu2 %v2521_v3  ;;  %2536 = vmatpush.bf16.msra.mxu3 %v2521_v3  ;;  %v2499_v33 = vld [vmem:[%s4198_s0 + $0x70] sm:$0xff]  ;;  %v2500_v37 = vld [vmem:[%s4198_s0 + $0x78] sm:$0xff]  ;;  %v2983_v40 = vld [vmem:[%s4200_s2] ss:$0 sm:$0xff] }
  0x10   :  { %v2507_v34 = vld [vmem:[%s4198_s0 + $0xb0] sm:$0xff]  ;;  %v2508_v38 = vld [vmem:[%s4198_s0 + $0xb8] sm:$0xff] }
  0x11   :  { %v2515_v35 = vld [vmem:[%s4198_s0 + $0xf0] sm:$0xff]  ;;  %v2516_v39 = vld [vmem:[%s4198_s0 + $0xf8] sm:$0xff] }
  0x12   :  { %471 = vmatpush.bf16.msra.mxu0 %v2520_v4  ;;  %2537 = vmatpush.bf16.msra.mxu1 %v2520_v4 }
  0x13   :  { %2538 = vmatpush.bf16.msra.mxu2 %v2520_v4  ;;  %2539 = vmatpush.bf16.msra.mxu3 %v2520_v4 }
  0x16   :  { %472 = vmatpush.bf16.msra.mxu0 %v2519_v5  ;;  %2540 = vmatpush.bf16.msra.mxu1 %v2519_v5 }
  0x17   :  { %2541 = vmatpush.bf16.msra.mxu2 %v2519_v5  ;;  %2542 = vmatpush.bf16.msra.mxu3 %v2519_v5 }
  0x1a   :  { %473 = vmatpush.bf16.msra.mxu0 %v2518_v6  ;;  %2543 = vmatpush.bf16.msra.mxu1 %v2518_v6 }
  0x1b   :  { %2544 = vmatpush.bf16.msra.mxu2 %v2518_v6  ;;  %2545 = vmatpush.bf16.msra.mxu3 %v2518_v6 }
  0x1e   :  { %474 = vmatpush.bf16.msra.mxu0 %v2517_v7  ;;  %2546 = vmatpush.bf16.msra.mxu1 %v2517_v7 }
  0x1f   :  { %2547 = vmatpush.bf16.msra.mxu2 %v2517_v7  ;;  %2548 = vmatpush.bf16.msra.mxu3 %v2517_v7 }
  0x21   :  { %475 = vmatmul.bf16.vlgmr.msra.gmra.mxu0 %v2485_v8  ;;  %515 = vmatmul.bf16.vlgmr.msra.gmra.mxu1 %v2493_v9 }
  0x22   :  { %555 = vmatmul.bf16.vlgmr.msra.gmra.mxu2 %v2501_v10  ;;  %595 = vmatmul.bf16.vlgmr.msra.gmra.mxu3 %v2509_v11 }
  0x31   :  { %480 = vmatmul.bf16.gmra.mxu0 %v2486_v12  ;;  %520 = vmatmul.bf16.gmra.mxu1 %v2494_v13 }
  0x32   :  { %560 = vmatmul.bf16.gmra.mxu2 %v2502_v14  ;;  %600 = vmatmul.bf16.gmra.mxu3 %v2510_v15 }
  0x41   :  { %485 = vmatmul.bf16.gmra.mxu0 %v2487_v16  ;;  %525 = vmatmul.bf16.gmra.mxu1 %v2495_v17 }
  0x42   :  { %565 = vmatmul.bf16.gmra.mxu2 %v2503_v18  ;;  %605 = vmatmul.bf16.gmra.mxu3 %v2511_v19 }
  0x51   :  { %490 = vmatmul.bf16.gmra.mxu0 %v2488_v20  ;;  %530 = vmatmul.bf16.gmra.mxu1 %v2496_v21 }
  0x52   :  { %570 = vmatmul.bf16.gmra.mxu2 %v2504_v22  ;;  %610 = vmatmul.bf16.gmra.mxu3 %v2512_v23 }
  0x61   :  { %495 = vmatmul.bf16.gmra.mxu0 %v2489_v24  ;;  %535 = vmatmul.bf16.gmra.mxu1 %v2497_v25 }
  0x62   :  { %575 = vmatmul.bf16.gmra.mxu2 %v2505_v26  ;;  %615 = vmatmul.bf16.gmra.mxu3 %v2513_v27 }
  0x71   :  { %500 = vmatmul.bf16.gmra.mxu0 %v2490_v28  ;;  %540 = vmatmul.bf16.gmra.mxu1 %v2498_v29 }
  0x72   :  { %580 = vmatmul.bf16.gmra.mxu2 %v2506_v30  ;;  %620 = vmatmul.bf16.gmra.mxu3 %v2514_v31 }
  0x81   :  { %505 = vmatmul.bf16.gmra.mxu0 %v2491_v32  ;;  %545 = vmatmul.bf16.gmra.mxu1 %v2499_v33 }
  0x82   :  { %585 = vmatmul.bf16.gmra.mxu2 %v2507_v34  ;;  %625 = vmatmul.bf16.gmra.mxu3 %v2515_v35 }
  0x91   :  { %510 = vmatmul.bf16.gmra.mxu0 %v2492_v36  ;;  %550 = vmatmul.bf16.gmra.mxu1 %v2500_v37 }
  0x92   :  { %590 = vmatmul.bf16.gmra.mxu2 %v2508_v38  ;;  %630 = vmatmul.bf16.gmra.mxu3 %v2516_v39 }
  0x9e   :  { %v476_v41 = vpop.f32.mrf.mxu0  ;;  %v516_v42 = vpop.f32.mrf.mxu1 }
  0x9f   :  { %v2986_v43 = vadd.f32 %v2983_v40, %v476_v41  ;;  %v2989_v44 = vadd.f32 %v2983_v40, %v516_v42 }
  0xa1   :  { %v2421_v45 = vmul.f32 -1.442695, %v2986_v43  ;;  %v2437_v46 = vmul.f32 -1.442695, %v2989_v44 }
  0xa3   :  { %2553 = vpow2.f32 %v2421_v45 }
  0xa4   :  { %2555 = vpow2.f32 %v2437_v46 }
  0xa5   :  { %v556_v47 = vpop.f32.mrf.mxu2  ;;  %v596_v48 = vpop.f32.mrf.mxu3 }
  0xa6   :  { %v2994_v49 = vadd.f32 %v2983_v40, %v556_v47  ;;  %v2997_v50 = vadd.f32 %v2983_v40, %v596_v48  ;;  %v478_v51 = vpop.f32.mrf.mxu0  ;;  %v518_v52 = vpop.f32.mrf.mxu1 }
  0xa7   :  { %v3000_v53 = vadd.f32 %v2983_v40, %v478_v51  ;;  %v3003_v54 = vadd.f32 %v2983_v40, %v518_v52 }
  0xa8   :  { %v2453_v55 = vmul.f32 -1.442695, %v2994_v49  ;;  %v2469_v56 = vmul.f32 -1.442695, %v2997_v50 }
  0xa9   :  { %v2554_v57 = vpop.eup %2553  ;;  %v2422_v60 = vmul.f32 -1.442695, %v3000_v53  ;;  %v2438_v62 = vmul.f32 -1.442695, %v3003_v54 }
  0xaa   :  { %v2556_v58 = vpop.eup %2555  ;;  %v3007_v59 = vadd.f32 1.0, %v2554_v57  ;;  %2557 = vpow2.f32 %v2453_v55 }
  0xab   :  { %v3010_v61 = vadd.f32 1.0, %v2556_v58  ;;  %2559 = vpow2.f32 %v2469_v56 }
  0xac   :  { %2561 = vrcp.f32 %v3007_v59  ;;  %v1164_v3 = vand.u32 2147483647, %v3007_v59  ;;  %v1166_v4 = vand.u32 2147483648, %v3007_v59  ;;  %vm1160_vm0 = vweird.f32 %v3007_v59 }
  0xad   :  { %2563 = vrcp.f32 %v3010_v61  ;;  %v558_v63 = vpop.f32.mrf.mxu2  ;;  %v598_v0 = vpop.f32.mrf.mxu3  ;;  %v1404_v6 = vand.u32 2147483647, %v3010_v61  ;;  %v1406_v7 = vand.u32 2147483648, %v3010_v61  ;;  %vm1400_vm1 = vweird.f32 %v3010_v61 }
  0xae   :  { %2565 = vpow2.f32 %v2422_v60  ;;  %v3016_v1 = vadd.f32 %v2983_v40, %v558_v63  ;;  %v481_v2 = vpop.f32.mrf.mxu0  ;;  %v3024_v9 = vadd.f32 %v2983_v40, %v598_v0  ;;  %v521_v15 = vpop.f32.mrf.mxu1  ;;  %vm3036_vm2 = vcmp.eq.f32.partialorder %v1164_v3, 8.507059e+37 }
  0xaf   :  { %2567 = vpow2.f32 %v2438_v62  ;;  %v3029_v12 = vadd.f32 %v2983_v40, %v481_v2  ;;  %v1167_v19 = vor.u32 1.1754944e-38, %v1166_v4  ;;  %vm3042_vm3 = vcmp.eq.f32.partialorder %v1404_v6, 8.507059e+37 }
  0xb0   :  { %v2558_v5 = vpop.eup %2557  ;;  %v2454_v8 = vmul.f32 -1.442695, %v3016_v1  ;;  %v1407_v23 = vor.u32 1.1754944e-38, %v1406_v7  ;;  %v2470_v24 = vmul.f32 -1.442695, %v3024_v9  ;;  %v3050_v28 = vadd.f32 %v2983_v40, %v521_v15 }
  0xb1   :  { %v2560_v10 = vpop.eup %2559  ;;  %v3026_v11 = vadd.f32 1.0, %v2558_v5  ;;  %v2423_v27 = vmul.f32 -1.442695, %v3029_v12 }
  0xb2   :  { %v2562_v13 = vpop.eup %2561  ;;  %v3033_v14 = vadd.f32 1.0, %v2560_v10  ;;  %v3063_v41 = vmul.f32 -1.442695, %v3050_v28 }
  0xb3   :  { %v2564_v16 = vpop.eup %2563  ;;  %v1156_v17 = vmul.f32 %v2562_v13, %v3007_v59  ;;  %2569 = vrcp.f32 %v3026_v11  ;;  %vm1161_vm4 = vweird.f32 %v2562_v13  ;;  %v1644_v30 = vand.u32 2147483647, %v3026_v11 }
  0xb4   :  { %v2566_v20 = vpop.eup %2565  ;;  %v1396_v21 = vmul.f32 %v2564_v16, %v3010_v61  ;;  %2571 = vpow2.f32 %v2454_v8  ;;  %v1646_v31 = vand.u32 2147483648, %v3026_v11  ;;  %v1886_v33 = vand.u32 2147483648, %v3033_v14  ;;  %vm1162_vm7 = vmor %vm1160_vm0, %vm1161_vm4 }
  0xb5   :  { %v2568_v25 = vpop.eup %2567  ;;  %v1157_v26 = vsub.f32 1.0, %v1156_v17  ;;  %2573 = vrcp.f32 %v3033_v14  ;;  %v3055_v34 = vadd.f32 1.0, %v2566_v20  ;;  %vm1401_vm5 = vweird.f32 %v2564_v16  ;;  %v561_v48 = vpop.f32.mrf.mxu2 }
  0xb6   :  { %v1397_v29 = vsub.f32 1.0, %v1396_v21  ;;  %v3057_v35 = vadd.f32 1.0, %v2568_v25  ;;  %v1884_v37 = vand.u32 2147483647, %v3033_v14  ;;  %2575 = vpow2.f32 %v2470_v24  ;;  %vm1402_vm10 = vmor %vm1400_vm1, %vm1401_vm5 }
  0xb7   :  { %v1158_v32 = vmul.f32 %v2562_v13, %v1157_v26  ;;  %vm1640_vm6 = vweird.f32 %v3026_v11  ;;  %2577 = vrcp.f32 %v3055_v34  ;;  %vm3069_vm8 = vcmp.eq.f32.partialorder %v1644_v30, 8.507059e+37 }
  0xb8   :  { %v1398_v36 = vmul.f32 %v2564_v16, %v1397_v29  ;;  %vm1880_vm9 = vweird.f32 %v3033_v14  ;;  %v1647_v55 = vor.u32 1.1754944e-38, %v1646_v31  ;;  %v1887_v56 = vor.u32 1.1754944e-38, %v1886_v33 }
  0xb9   :  { %v2570_v38 = vpop.eup %2569  ;;  %v1159_v39 = vadd.f32 %v2562_v13, %v1158_v32  ;;  %2579 = vrcp.f32 %v3057_v35  ;;  %vm3081_vm11 = vcmp.eq.f32.partialorder %v1884_v37, 8.507059e+37  ;;  %v1179_v0 = vand.u32 2147483647, %v3055_v34 }
  0xba   :  { %v2572_v42 = vpop.eup %2571  ;;  %v1399_v45 = vadd.f32 %v2564_v16, %v1398_v36  ;;  %v1636_v46 = vmul.f32 %v2570_v38, %v3026_v11  ;;  %v3090_v2 = vadd.f32 %v2983_v40, %v561_v48  ;;  %vm1641_vm12 = vweird.f32 %v2570_v38 }
  0xbb   :  { %v2574_v51 = vpop.eup %2573  ;;  %v1163_v52 = vsel %vm1162_vm7, %v2562_v13, %v1159_v39  ;;  %vm1175_vm13 = vweird.f32 %v3055_v34  ;;  %v3095_v8 = vadd.f32 1.0, %v2572_v42  ;;  %2581 = vpow2.f32 %v2423_v27  ;;  %vm1642_vm15 = vmor %vm1640_vm6, %vm1641_vm12 }
  0xbc   :  { %v1168_v57 = vsel %vm3036_vm2, %v1167_v19, %v1163_v52  ;;  %v1403_v58 = vsel %vm1402_vm10, %v2564_v16, %v1399_v45  ;;  %v1637_v59 = vsub.f32 1.0, %v1636_v46  ;;  %v1876_v60 = vmul.f32 %v2574_v51, %v3033_v14  ;;  %v2576_v3 = vpop.eup %2575 }
  0xbd   :  { %v2115_v63 = vmul.f32 %v1168_v57, %v2986_v43  ;;  %v1408_v61 = vsel %vm3042_vm3, %v1407_v23, %v1403_v58  ;;  %v2578_v7 = vpop.eup %2577  ;;  %v1181_v43 = vand.u32 2147483648, %v3055_v34  ;;  %vm1881_vm14 = vweird.f32 %v2574_v51 }
  0xbe   :  { %v2131_v4 = vmul.f32 %v1408_v61, %v2989_v44  ;;  %v1638_v5 = vmul.f32 %v2570_v38, %v1637_v59  ;;  %v1877_v6 = vsub.f32 1.0, %v1876_v60  ;;  %v1171_v15 = vmul.f32 %v2578_v7, %v3055_v34  ;;  %vm1882_vm1 = vmor %vm1880_vm9, %vm1881_vm14  ;;  %v523_v61 = vpop.f32.mrf.mxu1 }
  0xbf   :  { %2179 = vst [vmem:[#allocation3] sm:$0xff] %v2115_v63  ;;  %v2580_v16 = vpop.eup %2579  ;;  %vm3100_vm0 = vcmp.eq.f32.partialorder %v1179_v0, 8.507059e+37  ;;  %v1419_v17 = vand.u32 2147483647, %v3057_v35  ;;  %2583 = vrcp.f32 %v3095_v8  ;;  %v3106_v18 = vadd.f32 1.0, %v2576_v3 }
  0xc0   :  { %2195 = vst [vmem:[#allocation3 + $0x80] sm:$0xff] %v2131_v4  ;;  %v1639_v10 = vadd.f32 %v2570_v38, %v1638_v5  ;;  %v1878_v13 = vmul.f32 %v2574_v51, %v1877_v6  ;;  %v1172_v21 = vsub.f32 1.0, %v1171_v15  ;;  %v1411_v22 = vmul.f32 %v2580_v16, %v3057_v35 }
  0xc1   :  { %vm1176_vm2 = vweird.f32 %v2578_v7  ;;  %vm1415_vm3 = vweird.f32 %v3057_v35  ;;  %v1421_v11 = vand.u32 2147483648, %v3057_v35  ;;  %v2582_v29 = vpop.eup %2581  ;;  %v1182_v31 = vor.u32 1.1754944e-38, %v1181_v43  ;;  %v563_v43 = vpop.f32.mrf.mxu2 }
  0xc2   :  { %v1643_v19 = vsel %vm1642_vm15, %v2570_v38, %v1639_v10  ;;  %v1879_v20 = vadd.f32 %v2574_v51, %v1878_v13  ;;  %v1173_v26 = vmul.f32 %v2578_v7, %v1172_v21  ;;  %v1412_v27 = vsub.f32 1.0, %v1411_v22  ;;  %vm1177_vm6 = vmor %vm1175_vm13, %vm1176_vm2 }
  0xc3   :  { %v1648_v23 = vsel %vm3069_vm8, %v1647_v55, %v1643_v19  ;;  %vm3118_vm4 = vcmp.eq.f32.partialorder %v1419_v17, 8.507059e+37  ;;  %2585 = vrcp.f32 %v3106_v18  ;;  %vm1416_vm5 = vweird.f32 %v2580_v16 }
  0xc4   :  { %v2147_v24 = vmul.f32 %v1648_v23, %v2994_v49  ;;  %v1883_v25 = vsel %vm1882_vm1, %v2574_v51, %v1879_v20  ;;  %v1174_v33 = vadd.f32 %v2578_v7, %v1173_v26  ;;  %v1413_v36 = vmul.f32 %v2580_v16, %v1412_v27  ;;  %v601_v49 = vpop.f32.mrf.mxu3  ;;  %vm1417_vm7 = vmor %vm1415_vm3, %vm1416_vm5 }
  0xc5   :  { %v1888_v30 = vsel %vm3081_vm11, %v1887_v56, %v1883_v25  ;;  %v2584_v37 = vpop.eup %2583  ;;  %v1659_v38 = vand.u32 2147483647, %v3095_v8  ;;  %v1661_v39 = vand.u32 2147483648, %v3095_v8  ;;  %v3129_v42 = vadd.f32 1.0, %v2582_v29  ;;  %v483_v56 = vpop.f32.mrf.mxu0 }
  0xc6   :  { %2211 = vst [vmem:[#allocation3 + $0x100] sm:$0xff] %v2147_v24  ;;  %v2163_v14 = vmul.f32 %v1888_v30, %v2997_v50  ;;  %2587 = vpow2.f32 %v3063_v41  ;;  %v1178_v45 = vsel %vm1177_vm6, %v2578_v7, %v1174_v33  ;;  %v1414_v50 = vadd.f32 %v2580_v16, %v1413_v36 }
  0xc7   :  { %v1422_v46 = vor.u32 1.1754944e-38, %v1421_v11  ;;  %v1651_v47 = vmul.f32 %v2584_v37, %v3095_v8  ;;  %v1183_v48 = vsel %vm3100_vm0, %v1182_v31, %v1178_v45  ;;  %vm1655_vm8 = vweird.f32 %v3095_v8 }
  0xc8   :  { %2227 = vst [vmem:[#allocation3 + $0x180] sm:$0xff] %v2163_v14  ;;  %v1899_v34 = vand.u32 2147483647, %v3106_v18  ;;  %2589 = vrcp.f32 %v3129_v42  ;;  %v2116_v41 = vmul.f32 %v1183_v48, %v3000_v53  ;;  %v1418_v51 = vsel %vm1417_vm7, %v2580_v16, %v1414_v50 }
  0xc9   :  { %v1652_v52 = vsub.f32 1.0, %v1651_v47  ;;  %v1901_v55 = vand.u32 2147483648, %v3106_v18  ;;  %v2586_v57 = vpop.eup %2585  ;;  %v1423_v58 = vsel %vm3118_vm4, %v1422_v46, %v1418_v51  ;;  %vm3144_vm9 = vcmp.eq.f32.partialorder %v1659_v38, 8.507059e+37  ;;  %v566_v3 = vpop.f32.mrf.mxu2 }
  0xca   :  { %v1662_v59 = vor.u32 1.1754944e-38, %v1661_v39  ;;  %v2455_v60 = vmul.f32 -1.442695, %v3090_v2  ;;  %2180 = vst [vmem:[#allocation3 + $0x8] sm:$0xff] %v2116_v41  ;;  %v2132_v62 = vmul.f32 %v1423_v58, %v3003_v54  ;;  %vm1656_vm10 = vweird.f32 %v2584_v37 }
  0xcb   :  { %v1653_v53 = vmul.f32 %v2584_v37, %v1652_v52  ;;  %v1891_v63 = vmul.f32 %v2586_v57, %v3106_v18  ;;  %vm1895_vm11 = vweird.f32 %v3106_v18  ;;  %vm3152_vm12 = vcmp.eq.f32.partialorder %v1899_v34, 8.507059e+37  ;;  %vm1657_vm13 = vmor %vm1655_vm8, %vm1656_vm10 }
  0xcc   :  { %v2588_v0 = vpop.eup %2587  ;;  %2591 = vpow2.f32 %v2455_v60  ;;  %v3157_v4 = vadd.f32 %v2983_v40, %v601_v49  ;;  %2196 = vst [vmem:[#allocation3 + $0x88] sm:$0xff] %v2132_v62  ;;  %v1902_v54 = vor.u32 1.1754944e-38, %v1901_v55  ;;  %vm1190_vm14 = vweird.f32 %v3129_v42  ;;  %v603_v20 = vpop.f32.mrf.mxu3 }
  0xcd   :  { %v1654_v5 = vadd.f32 %v2584_v37, %v1653_v53  ;;  %v1892_v6 = vsub.f32 1.0, %v1891_v63  ;;  %v3159_v7 = vadd.f32 1.0, %v2588_v0  ;;  %v3167_v15 = vadd.f32 %v2983_v40, %v483_v56  ;;  %v486_v14 = vpop.f32.mrf.mxu0 }
  0xce   :  { %v2590_v10 = vpop.eup %2589  ;;  %v2471_v13 = vmul.f32 -1.442695, %v3157_v4  ;;  %v3170_v16 = vadd.f32 %v2983_v40, %v523_v61  ;;  %vm1896_vm15 = vweird.f32 %v2586_v57  ;;  %v1196_v21 = vand.u32 2147483648, %v3129_v42 }
  0xcf   :  { %v1658_v44 = vsel %vm1657_vm13, %v2584_v37, %v1654_v5  ;;  %v1893_v17 = vmul.f32 %v2586_v57, %v1892_v6  ;;  %v1186_v19 = vmul.f32 %v2590_v10, %v3129_v42  ;;  %2593 = vrcp.f32 %v3159_v7  ;;  %vm1897_vm0 = vmor %vm1895_vm11, %vm1896_vm15 }
  0xd0   :  { %v1663_v8 = vsel %vm3144_vm9, %v1662_v59, %v1658_v44  ;;  %v3178_v22 = vadd.f32 %v2983_v40, %v563_v43  ;;  %v1194_v25 = vand.u32 2147483647, %v3129_v42  ;;  %2595 = vpow2.f32 %v2471_v13  ;;  %v526_v59 = vpop.f32.mrf.mxu1 }
  0xd1   :  { %v2148_v23 = vmul.f32 %v1663_v8, %v3016_v1  ;;  %v1894_v11 = vadd.f32 %v2586_v57, %v1893_v17  ;;  %v1187_v24 = vsub.f32 1.0, %v1186_v19  ;;  %v2424_v27 = vmul.f32 -1.442695, %v3167_v15 }
  0xd2   :  { %v2592_v26 = vpop.eup %2591  ;;  %v2440_v29 = vmul.f32 -1.442695, %v3170_v16  ;;  %v3187_v30 = vadd.f32 %v2983_v40, %v603_v20  ;;  %vm1191_vm1 = vweird.f32 %v2590_v10  ;;  %v1197_v18 = vor.u32 1.1754944e-38, %v1196_v21 }
  0xd3   :  { %2212 = vst [vmem:[#allocation3 + $0x108] sm:$0xff] %v2148_v23  ;;  %v1898_v31 = vsel %vm1897_vm0, %v2586_v57, %v1894_v11  ;;  %v1188_v32 = vmul.f32 %v2590_v10, %v1187_v24  ;;  %v3189_v1 = vadd.f32 1.0, %v2592_v26  ;;  %2597 = vpow2.f32 %v2424_v27  ;;  %vm1192_vm2 = vmor %vm1190_vm14, %vm1191_vm1 }
  0xd4   :  { %v1903_v33 = vsel %vm3152_vm12, %v1902_v54, %v1898_v31  ;;  %v2456_v36 = vmul.f32 -1.442695, %v3178_v22  ;;  %v1434_v38 = vand.u32 2147483647, %v3159_v7  ;;  %v1436_v45 = vand.u32 2147483648, %v3159_v7  ;;  %v606_v5 = vpop.f32.mrf.mxu3 }
  0xd5   :  { %v2164_v49 = vmul.f32 %v1903_v33, %v3024_v9  ;;  %v1189_v37 = vadd.f32 %v2590_v10, %v1188_v32  ;;  %2599 = vrcp.f32 %v3189_v1  ;;  %v2594_v39 = vpop.eup %2593  ;;  %v2472_v50 = vmul.f32 -1.442695, %v3187_v30  ;;  %v488_v19 = vpop.f32.mrf.mxu0 }
  0xd6   :  { %2601 = vpow2.f32 %v2440_v29  ;;  %v3202_v46 = vadd.f32 %v2983_v40, %v486_v14  ;;  %vm1195_vm3 = vcmp.eq.f32.partialorder %v1194_v25, 8.507059e+37  ;;  %v1426_v9 = vmul.f32 %v2594_v39, %v3159_v7  ;;  %v2596_v48 = vpop.eup %2595 }
  0xd7   :  { %2228 = vst [vmem:[#allocation3 + $0x188] sm:$0xff] %v2164_v49  ;;  %v1193_v47 = vsel %vm1192_vm2, %v2590_v10, %v1189_v37  ;;  %v1674_v41 = vand.u32 2147483647, %v3189_v1  ;;  %v1676_v42 = vand.u32 2147483648, %v3189_v1  ;;  %2603 = vpow2.f32 %v2456_v36 }
  0xd8   :  { %v1198_v34 = vsel %vm1195_vm3, %v1197_v18, %v1193_v47  ;;  %v1427_v52 = vsub.f32 1.0, %v1426_v9  ;;  %v3208_v55 = vadd.f32 1.0, %v2596_v48  ;;  %v2425_v56 = vmul.f32 -1.442695, %v3202_v46 }
  0xd9   :  { %v2117_v51 = vmul.f32 %v1198_v34, %v3029_v12  ;;  %v2598_v57 = vpop.eup %2597  ;;  %vm1430_vm4 = vweird.f32 %v3159_v7  ;;  %vm3212_vm5 = vcmp.eq.f32.partialorder %v1434_v38, 8.507059e+37  ;;  %v1437_v35 = vor.u32 1.1754944e-38, %v1436_v45 }
  0xda   :  { %2605 = vpow2.f32 %v2472_v50  ;;  %v1428_v62 = vmul.f32 %v2594_v39, %v1427_v52  ;;  %vm1431_vm6 = vweird.f32 %v2594_v39  ;;  %vm1670_vm7 = vweird.f32 %v3189_v1 }
  0xdb   :  { %v2600_v60 = vpop.eup %2599  ;;  %2181 = vst [vmem:[#allocation3 + $0x10] sm:$0xff] %v2117_v51  ;;  %2607 = vrcp.f32 %v3208_v55  ;;  %vm3219_vm8 = vcmp.eq.f32.partialorder %v1674_v41, 8.507059e+37  ;;  %v1677_v61 = vor.u32 1.1754944e-38, %v1676_v42  ;;  %v3223_v0 = vadd.f32 1.0, %v2598_v57  ;;  %vm1432_vm9 = vmor %vm1430_vm4, %vm1431_vm6 }
  0xdc   :  { %v2602_v12 = vpop.eup %2601  ;;  %v1666_v53 = vmul.f32 %v2600_v60, %v3189_v1  ;;  %v1429_v6 = vadd.f32 %v2594_v39, %v1428_v62  ;;  %2609 = vpow2.f32 %v2425_v56  ;;  %v3228_v43 = vadd.f32 %v2983_v40, %v526_v59 }
  0xdd   :  { %v3225_v54 = vadd.f32 1.0, %v2602_v12  ;;  %v2604_v10 = vpop.eup %2603  ;;  %v1914_v44 = vand.u32 2147483647, %v3208_v55  ;;  %v1916_v17 = vand.u32 2147483648, %v3208_v55  ;;  %2611 = vrcp.f32 %v3223_v0 }
  0xde   :  { %v1667_v13 = vsub.f32 1.0, %v1666_v53  ;;  %v1433_v20 = vsel %vm1432_vm9, %v2594_v39, %v1429_v6  ;;  %v3238_v8 = vadd.f32 %v2983_v40, %v566_v3  ;;  %v3241_v21 = vadd.f32 %v2983_v40, %v606_v5 }
  0xdf   :  { %2613 = vrcp.f32 %v3225_v54  ;;  %v1438_v7 = vsel %vm3212_vm5, %v1437_v35, %v1433_v20  ;;  %vm1671_vm10 = vweird.f32 %v2600_v60  ;;  %v1211_v24 = vand.u32 2147483648, %v3223_v0 }
  0xe0   :  { %v2606_v23 = vpop.eup %2605  ;;  %v1668_v11 = vmul.f32 %v2600_v60, %v1667_v13  ;;  %v2133_v26 = vmul.f32 %v1438_v7, %v3050_v28  ;;  %vm1910_vm11 = vweird.f32 %v3208_v55  ;;  %v1209_v27 = vand.u32 2147483647, %v3223_v0  ;;  %vm1672_vm13 = vmor %vm1670_vm7, %vm1671_vm10 }
  0xe1   :  { %v2608_v25 = vpop.eup %2607  ;;  %v3250_v29 = vadd.f32 %v2983_v40, %v488_v19  ;;  %vm3253_vm12 = vcmp.eq.f32.partialorder %v1914_v44, 8.507059e+37  ;;  %v1917_v33 = vor.u32 1.1754944e-38, %v1916_v17  ;;  %vm1205_vm14 = vweird.f32 %v3223_v0 }
  0xe2   :  { %v1669_v31 = vadd.f32 %v2600_v60, %v1668_v11  ;;  %v1906_v32 = vmul.f32 %v2608_v25, %v3208_v55  ;;  %v2610_v18 = vpop.eup %2609  ;;  %2197 = vst [vmem:[#allocation3 + $0x90] sm:$0xff] %v2133_v26  ;;  %v1449_v28 = vand.u32 2147483647, %v3225_v54  ;;  %v1451_v36 = vand.u32 2147483648, %v3225_v54  ;;  %v528_v26 = vpop.f32.mrf.mxu1 }
  0xe3   :  { %v3262_v49 = vadd.f32 1.0, %v2604_v10  ;;  %v2612_v37 = vpop.eup %2611  ;;  %v1212_v45 = vor.u32 1.1754944e-38, %v1211_v24  ;;  %vm1445_vm15 = vweird.f32 %v3225_v54  ;;  %v3265_v50 = vadd.f32 1.0, %v2606_v23 }
  0xe4   :  { %v1673_v38 = vsel %vm1672_vm13, %v2600_v60, %v1669_v31  ;;  %v1907_v39 = vsub.f32 1.0, %v1906_v32  ;;  %vm1911_vm0 = vweird.f32 %v2608_v25  ;;  %v1201_v9 = vmul.f32 %v2612_v37, %v3223_v0 }
  0xe5   :  { %v2614_v47 = vpop.eup %2613  ;;  %v1678_v1 = vsel %vm3219_vm8, %v1677_v61, %v1673_v38  ;;  %vm3270_vm1 = vcmp.eq.f32.partialorder %v1209_v27, 8.507059e+37  ;;  %2615 = vrcp.f32 %v3262_v49  ;;  %v3277_v51 = vadd.f32 1.0, %v2610_v18  ;;  %vm1912_vm3 = vmor %vm1910_vm11, %vm1911_vm0 }
  0xe6   :  { %v2149_v34 = vmul.f32 %v1678_v1, %v3090_v2  ;;  %v1908_v41 = vmul.f32 %v2608_v25, %v1907_v39  ;;  %v1441_v42 = vmul.f32 %v2614_v47, %v3225_v54  ;;  %v1202_v52 = vsub.f32 1.0, %v1201_v9 }
  0xe7   :  { %vm3279_vm2 = vcmp.eq.f32.partialorder %v1449_v28, 8.507059e+37  ;;  %v1452_v57 = vor.u32 1.1754944e-38, %v1451_v36  ;;  %v2441_v58 = vmul.f32 -1.442695, %v3228_v43  ;;  %v1689_v60 = vand.u32 2147483647, %v3262_v49  ;;  %v608_v36 = vpop.f32.mrf.mxu3 }
  0xe8   :  { %2213 = vst [vmem:[#allocation3 + $0x110] sm:$0xff] %v2149_v34  ;;  %v1909_v35 = vadd.f32 %v2608_v25, %v1908_v41  ;;  %v1442_v59 = vsub.f32 1.0, %v1441_v42  ;;  %2617 = vrcp.f32 %v3265_v50  ;;  %v1203_v2 = vmul.f32 %v2612_v37, %v1202_v52 }
  0xe9   :  { %vm1206_vm4 = vweird.f32 %v2612_v37  ;;  %v1691_v62 = vand.u32 2147483648, %v3262_v49  ;;  %v2457_v12 = vmul.f32 -1.442695, %v3238_v8  ;;  %vm1446_vm5 = vweird.f32 %v2614_v47 }
  0xea   :  { %v1913_v53 = vsel %vm1912_vm3, %v2608_v25, %v1909_v35  ;;  %v1443_v63 = vmul.f32 %v2614_v47, %v1442_v59  ;;  %2619 = vrcp.f32 %v3277_v51  ;;  %v1204_v5 = vadd.f32 %v2612_v37, %v1203_v2  ;;  %vm1207_vm7 = vmor %vm1205_vm14, %vm1206_vm4 }
  0xeb   :  { %v2616_v61 = vpop.eup %2615  ;;  %v1918_v3 = vsel %vm3253_vm12, %v1917_v33, %v1913_v53  ;;  %vm1685_vm6 = vweird.f32 %v3262_v49  ;;  %v1929_v55 = vand.u32 2147483647, %v3265_v50  ;;  %vm3300_vm8 = vcmp.eq.f32.partialorder %v1689_v60, 8.507059e+37  ;;  %vm1447_vm9 = vmor %vm1445_vm15, %vm1446_vm5 }
  0xec   :  { %v2165_v6 = vmul.f32 %v1918_v3, %v3157_v4  ;;  %v1444_v10 = vadd.f32 %v2614_v47, %v1443_v63  ;;  %v1681_v13 = vmul.f32 %v2616_v61, %v3262_v49  ;;  %v1208_v17 = vsel %vm1207_vm7, %v2612_v37, %v1204_v5 }
  0xed   :  { %v1692_v19 = vor.u32 1.1754944e-38, %v1691_v62  ;;  %vm1925_vm10 = vweird.f32 %v3265_v50  ;;  %v1931_v20 = vand.u32 2147483648, %v3265_v50  ;;  %vm1220_vm11 = vweird.f32 %v3277_v51 }
  0xee   :  { %v2618_v4 = vpop.eup %2617  ;;  %2229 = vst [vmem:[#allocation3 + $0x190] sm:$0xff] %v2165_v6  ;;  %v1213_v0 = vsel %vm3270_vm1, %v1212_v45, %v1208_v17  ;;  %v1448_v23 = vsel %vm1447_vm9, %v2614_v47, %v1444_v10  ;;  %v1682_v7 = vsub.f32 1.0, %v1681_v13  ;;  %2621 = vpow2.f32 %v2441_v58  ;;  %v531_v17 = vpop.f32.mrf.mxu1 }
  0xef   :  { %v2118_v11 = vmul.f32 %v1213_v0, %v3167_v15  ;;  %v1453_v54 = vsel %vm3279_vm2, %v1452_v57, %v1448_v23  ;;  %vm1686_vm12 = vweird.f32 %v2616_v61  ;;  %v1921_v24 = vmul.f32 %v2618_v4, %v3265_v50  ;;  %v568_v15 = vpop.f32.mrf.mxu2  ;;  %v491_v57 = vpop.f32.mrf.mxu0 }
  0xf0   :  { %vm3315_vm13 = vcmp.eq.f32.partialorder %v1929_v55, 8.507059e+37  ;;  %v2620_v27 = vpop.eup %2619  ;;  %v2134_v31 = vmul.f32 %v1453_v54, %v3170_v16  ;;  %v1683_v32 = vmul.f32 %v2616_v61, %v1682_v7  ;;  %v1224_v14 = vand.u32 2147483647, %v3277_v51  ;;  %vm1687_vm15 = vmor %vm1685_vm6, %vm1686_vm12 }
  0xf1   :  { %v1226_v33 = vand.u32 2147483648, %v3277_v51  ;;  %2182 = vst [vmem:[#allocation3 + $0x18] sm:$0xff] %v2118_v11  ;;  %v1922_v18 = vsub.f32 1.0, %v1921_v24  ;;  %vm1926_vm14 = vweird.f32 %v2618_v4  ;;  %v1216_v28 = vmul.f32 %v2620_v27, %v3277_v51 }
  0xf2   :  { %2623 = vpow2.f32 %v2457_v12  ;;  %2198 = vst [vmem:[#allocation3 + $0x98] sm:$0xff] %v2134_v31  ;;  %v1684_v37 = vadd.f32 %v2616_v61, %v1683_v32  ;;  %v2473_v38 = vmul.f32 -1.442695, %v3241_v21  ;;  %v2426_v39 = vmul.f32 -1.442695, %v3250_v29  ;;  %vm1927_vm1 = vmor %vm1925_vm10, %vm1926_vm14 }
  0xf3   :  { %v3326_v16 = vadd.f32 %v2983_v40, %v528_v26  ;;  %v1923_v45 = vmul.f32 %v2618_v4, %v1922_v18  ;;  %v1217_v47 = vsub.f32 1.0, %v1216_v28  ;;  %vm1221_vm0 = vweird.f32 %v2620_v27 }
  0xf4   :  { %v3332_v1 = vadd.f32 %v2983_v40, %v568_v15  ;;  %v2622_v9 = vpop.eup %2621  ;;  %v1688_v48 = vsel %vm1687_vm15, %v2616_v61, %v1684_v37  ;;  %2625 = vpow2.f32 %v2473_v38  ;;  %v3336_v41 = vadd.f32 %v2983_v40, %v608_v36  ;;  %vm1222_vm3 = vmor %vm1220_vm11, %vm1221_vm0 }
  0xf5   :  { %v2442_v34 = vmul.f32 -1.442695, %v3326_v16  ;;  %v1693_v42 = vsel %vm3300_vm8, %v1692_v19, %v1688_v48  ;;  %v1924_v52 = vadd.f32 %v2618_v4, %v1923_v45  ;;  %v1218_v49 = vmul.f32 %v2620_v27, %v1217_v47 }
  0xf6   :  { %v3340_v56 = vadd.f32 1.0, %v2622_v9  ;;  %v2150_v58 = vmul.f32 %v1693_v42, %v3178_v22  ;;  %v1932_v35 = vor.u32 1.1754944e-38, %v1931_v20  ;;  %vm3346_vm2 = vcmp.eq.f32.partialorder %v1224_v14, 8.507059e+37 }
  0xf7   :  { %2627 = vpow2.f32 %v2426_v39  ;;  %v1928_v2 = vsel %vm1927_vm1, %v2618_v4, %v1924_v52  ;;  %v1219_v62 = vadd.f32 %v2620_v27, %v1218_v49  ;;  %v1227_v12 = vor.u32 1.1754944e-38, %v1226_v33  ;;  %v571_v23 = vpop.f32.mrf.mxu2 }
  0xf8   :  { %v2624_v60 = vpop.eup %2623  ;;  %2629 = vrcp.f32 %v3340_v56  ;;  %2214 = vst [vmem:[#allocation3 + $0x118] sm:$0xff] %v2150_v58  ;;  %v1933_v22 = vsel %vm3315_vm13, %v1932_v35, %v1928_v2  ;;  %v2458_v53 = vmul.f32 -1.442695, %v3332_v1  ;;  %v3360_v63 = vadd.f32 %v2983_v40, %v491_v57 }
  0xf9   :  { %v3356_v50 = vadd.f32 1.0, %v2624_v60  ;;  %v2166_v61 = vmul.f32 %v1933_v22, %v3187_v30  ;;  %v1223_v3 = vsel %vm1222_vm3, %v2620_v27, %v1219_v62  ;;  %2631 = vpow2.f32 %v2442_v34 }
  0xfa   :  { %v2474_v5 = vmul.f32 -1.442695, %v3336_v41  ;;  %v2626_v55 = vpop.eup %2625  ;;  %v1228_v6 = vsel %vm3346_vm2, %v1227_v12, %v1223_v3  ;;  %v1464_v51 = vand.u32 2147483647, %v3340_v56  ;;  %v1466_v10 = vand.u32 2147483648, %v3340_v56 }
  0xfb   :  { %2633 = vrcp.f32 %v3356_v50  ;;  %2230 = vst [vmem:[#allocation3 + $0x198] sm:$0xff] %v2166_v61  ;;  %v2119_v13 = vmul.f32 %v1228_v6, %v3202_v46  ;;  %vm1460_vm4 = vweird.f32 %v3340_v56  ;;  %v3371_v30 = vadd.f32 1.0, %v2626_v55 }
  0xfc   :  { %2635 = vpow2.f32 %v2458_v53  ;;  %v1704_v20 = vand.u32 2147483647, %v3356_v50  ;;  %v2427_v0 = vmul.f32 -1.442695, %v3360_v63  ;;  %vm3378_vm5 = vcmp.eq.f32.partialorder %v1464_v51, 8.507059e+37 }
  0xfd   :  { %v2628_v44 = vpop.eup %2627  ;;  %2183 = vst [vmem:[#allocation3 + $0x20] sm:$0xff] %v2119_v13  ;;  %2637 = vpow2.f32 %v2474_v5  ;;  %v1467_v11 = vor.u32 1.1754944e-38, %v1466_v10  ;;  %vm1700_vm6 = vweird.f32 %v3356_v50  ;;  %v1706_v24 = vand.u32 2147483648, %v3356_v50 }
  0xfe   :  { %v2630_v19 = vpop.eup %2629  ;;  %v3374_v4 = vadd.f32 1.0, %v2628_v44  ;;  %2639 = vrcp.f32 %v3371_v30  ;;  %v3387_v25 = vadd.f32 %v2983_v40, %v531_v17  ;;  %v1946_v31 = vand.u32 2147483648, %v3371_v30 }
  0xff   :  { %v1456_v7 = vmul.f32 %v2630_v19, %v3340_v56  ;;  %v2632_v54 = vpop.eup %2631  ;;  %v3393_v14 = vadd.f32 %v2983_v40, %v571_v23  ;;  %vm3396_vm7 = vcmp.eq.f32.partialorder %v1704_v20, 8.507059e+37  ;;  %v1944_v18 = vand.u32 2147483647, %v3371_v30 }
 0x100   :  { %2641 = vrcp.f32 %v3374_v4  ;;  %v3390_v32 = vadd.f32 1.0, %v2632_v54  ;;  %v1241_v28 = vand.u32 2147483648, %v3374_v4  ;;  %vm1461_vm8 = vweird.f32 %v2630_v19 }
 0x101   :  { %v2634_v26 = vpop.eup %2633  ;;  %v1457_v27 = vsub.f32 1.0, %v1456_v7  ;;  %v1239_v38 = vand.u32 2147483647, %v3374_v4  ;;  %v1707_v45 = vor.u32 1.1754944e-38, %v1706_v24  ;;  %vm1940_vm10 = vweird.f32 %v3371_v30  ;;  %vm1462_vm12 = vmor %vm1460_vm4, %vm1461_vm8  ;;  %v611_v24 = vpop.f32.mrf.mxu3 }
 0x102   :  { %v1696_v33 = vmul.f32 %v2634_v26, %v3356_v50  ;;  %v2636_v36 = vpop.eup %2635  ;;  %2643 = vrcp.f32 %v3390_v32  ;;  %vm1701_vm9 = vweird.f32 %v2634_v26  ;;  %v1947_v48 = vor.u32 1.1754944e-38, %v1946_v31 }
 0x103   :  { %v1458_v37 = vmul.f32 %v2630_v19, %v1457_v27  ;;  %v2638_v39 = vpop.eup %2637  ;;  %vm1235_vm11 = vweird.f32 %v3374_v4  ;;  %v3406_v34 = vadd.f32 1.0, %v2636_v36  ;;  %2645 = vpow2.f32 %v2427_v0  ;;  %vm1702_vm15 = vmor %vm1700_vm6, %vm1701_vm9 }
 0x104   :  { %v1697_v40 = vsub.f32 1.0, %v1696_v33  ;;  %v2640_v47 = vpop.eup %2639  ;;  %vm3412_vm13 = vcmp.eq.f32.partialorder %v1944_v18, 8.507059e+37  ;;  %v1242_v58 = vor.u32 1.1754944e-38, %v1241_v28  ;;  %v1479_v35 = vand.u32 2147483647, %v3390_v32 }
 0x105   :  { %v1459_v9 = vadd.f32 %v2630_v19, %v1458_v37  ;;  %v1936_v49 = vmul.f32 %v2640_v47, %v3371_v30  ;;  %vm3418_vm14 = vcmp.eq.f32.partialorder %v1239_v38, 8.507059e+37  ;;  %v1481_v56 = vand.u32 2147483648, %v3390_v32 }
 0x106   :  { %v2642_v42 = vpop.eup %2641  ;;  %v1698_v52 = vmul.f32 %v2634_v26, %v1697_v40  ;;  %v3423_v62 = vadd.f32 1.0, %v2638_v39  ;;  %2647 = vrcp.f32 %v3406_v34  ;;  %vm1941_vm0 = vweird.f32 %v2640_v47  ;;  %v493_v40 = vpop.f32.mrf.mxu0 }
 0x107   :  { %v1463_v59 = vsel %vm1462_vm12, %v2630_v19, %v1459_v9  ;;  %v1231_v60 = vmul.f32 %v2642_v42, %v3374_v4  ;;  %v1937_v53 = vsub.f32 1.0, %v1936_v49  ;;  %vm1475_vm1 = vweird.f32 %v3390_v32  ;;  %vm1942_vm4 = vmor %vm1940_vm10, %vm1941_vm0 }
 0x108   :  { %v1468_v12 = vsel %vm3378_vm5, %v1467_v11, %v1463_v59  ;;  %v1699_v22 = vadd.f32 %v2634_v26, %v1698_v52  ;;  %v2644_v61 = vpop.eup %2643  ;;  %vm3434_vm2 = vcmp.eq.f32.partialorder %v1479_v35, 8.507059e+37  ;;  %vm1236_vm3 = vweird.f32 %v2642_v42  ;;  %v3483_v59 = vld [vmem:[%s4200_s2] ss:$0 sm:$0xff] }
 0x109   :  { %v2135_v3 = vmul.f32 %v1468_v12, %v3228_v43  ;;  %v1232_v5 = vsub.f32 1.0, %v1231_v60  ;;  %v1938_v6 = vmul.f32 %v2640_v47, %v1937_v53  ;;  %v1471_v51 = vmul.f32 %v2644_v61, %v3390_v32  ;;  %v2646_v13 = vpop.eup %2645 }
 0x10a   :  { %v1703_v55 = vsel %vm1702_vm15, %v2634_v26, %v1699_v22  ;;  %v1482_v50 = vor.u32 1.1754944e-38, %v1481_v56  ;;  %2649 = vrcp.f32 %v3423_v62  ;;  %vm1476_vm5 = vweird.f32 %v2644_v61 }
 0x10b   :  { %2199 = vst [vmem:[#allocation3 + $0xa0] sm:$0xff] %v2135_v3  ;;  %v1708_v43 = vsel %vm3396_vm7, %v1707_v45, %v1703_v55  ;;  %v1233_v44 = vmul.f32 %v2642_v42, %v1232_v5  ;;  %v1939_v19 = vadd.f32 %v2640_v47, %v1938_v6  ;;  %v1472_v20 = vsub.f32 1.0, %v1471_v51  ;;  %vm1237_vm7 = vmor %vm1235_vm11, %vm1236_vm3  ;;  %v613_v55 = vpop.f32.mrf.mxu3 }
 0x10c   :  { %v2151_v17 = vmul.f32 %v1708_v43, %v3238_v8  ;;  %vm1715_vm6 = vweird.f32 %v3406_v34  ;;  %v1719_v23 = vand.u32 2147483647, %v3406_v34  ;;  %v2648_v7 = vpop.eup %2647  ;;  %v1721_v11 = vand.u32 2147483648, %v3406_v34  ;;  %vm1477_vm8 = vmor %vm1475_vm1, %vm1476_vm5 }
 0x10d   :  { %v1234_v0 = vadd.f32 %v2642_v42, %v1233_v44  ;;  %v1943_v46 = vsel %vm1942_vm4, %v2640_v47, %v1939_v19  ;;  %v1473_v8 = vmul.f32 %v2644_v61, %v1472_v20  ;;  %v3450_v54 = vadd.f32 1.0, %v2646_v13 }
 0x10e   :  { %2215 = vst [vmem:[#allocation3 + $0x120] sm:$0xff] %v2151_v17  ;;  %v1948_v30 = vsel %vm3412_vm13, %v1947_v48, %v1943_v46  ;;  %v1711_v27 = vmul.f32 %v2648_v7, %v3406_v34  ;;  %v1959_v31 = vand.u32 2147483647, %v3423_v62  ;;  %v1961_v18 = vand.u32 2147483648, %v3423_v62  ;;  %v573_v48 = vpop.f32.mrf.mxu2 }
 0x10f   :  { %v1238_v26 = vsel %vm1237_vm7, %v2642_v42, %v1234_v0  ;;  %v2167_v33 = vmul.f32 %v1948_v30, %v3241_v21  ;;  %v1474_v15 = vadd.f32 %v2644_v61, %v1473_v8  ;;  %vm3464_vm9 = vcmp.eq.f32.partialorder %v1719_v23, 8.507059e+37  ;;  %v496_v0 = vpop.f32.mrf.mxu0 }
 0x110   :  { %v1243_v4 = vsel %vm3418_vm14, %v1242_v58, %v1238_v26  ;;  %v1712_v36 = vsub.f32 1.0, %v1711_v27  ;;  %2651 = vrcp.f32 %v3450_v54  ;;  %v2650_v21 = vpop.eup %2649  ;;  %vm1716_vm10 = vweird.f32 %v2648_v7 }
 0x111   :  { %v2120_v28 = vmul.f32 %v1243_v4, %v3250_v29  ;;  %2231 = vst [vmem:[#allocation3 + $0x1a0] sm:$0xff] %v2167_v33  ;;  %v1478_v38 = vsel %vm1477_vm8, %v2644_v61, %v1474_v15  ;;  %v1722_v39 = vor.u32 1.1754944e-38, %v1721_v11  ;;  %vm1955_vm11 = vweird.f32 %v3423_v62  ;;  %v533_v29 = vpop.f32.mrf.mxu1  ;;  %vm1717_vm14 = vmor %vm1715_vm6, %vm1716_vm10 }
 0x112   :  { %v1483_v32 = vsel %vm3434_vm2, %v1482_v50, %v1478_v38  ;;  %v1713_v45 = vmul.f32 %v2648_v7, %v1712_v36  ;;  %v1951_v47 = vmul.f32 %v2650_v21, %v3423_v62  ;;  %vm3473_vm12 = vcmp.eq.f32.partialorder %v1959_v31, 8.507059e+37 }
 0x113   :  { %2184 = vst [vmem:[#allocation3 + $0x28] sm:$0xff] %v2120_v28  ;;  %v2136_v42 = vmul.f32 %v1483_v32, %v3326_v16  ;;  %vm1956_vm13 = vweird.f32 %v2650_v21  ;;  %v1962_v52 = vor.u32 1.1754944e-38, %v1961_v18  ;;  %v2443_v49 = vmul.f32 -1.442695, %v3387_v25 }
 0x114   :  { %v1714_v57 = vadd.f32 %v2648_v7, %v1713_v45  ;;  %v1952_v58 = vsub.f32 1.0, %v1951_v47  ;;  %v2459_v35 = vmul.f32 -1.442695, %v3393_v14  ;;  %v3486_v60 = vadd.f32 %v3483_v59, %v611_v24  ;;  %vm1957_vm0 = vmor %vm1955_vm11, %vm1956_vm13 }
 0x115   :  { %2200 = vst [vmem:[#allocation3 + $0xa8] sm:$0xff] %v2136_v42  ;;  %2653 = vpow2.f32 %v2443_v49  ;;  %v3492_v16 = vadd.f32 %v3483_v59, %v493_v40  ;;  %v3495_v2 = vadd.f32 %v3483_v59, %v533_v29  ;;  %v3498_v56 = vadd.f32 %v3483_v59, %v573_v48 }
 0x116   :  { %v2652_v12 = vpop.eup %2651  ;;  %v1718_v22 = vsel %vm1717_vm14, %v2648_v7, %v1714_v57  ;;  %v1953_v53 = vmul.f32 %v2650_v21, %v1952_v58  ;;  %2655 = vpow2.f32 %v2459_v35  ;;  %v2475_v61 = vmul.f32 -1.442695, %v3486_v60  ;;  %v576_v28 = vpop.f32.mrf.mxu2 }
 0x117   :  { %v1723_v34 = vsel %vm3464_vm9, %v1722_v39, %v1718_v22  ;;  %v1246_v3 = vmul.f32 %v2652_v12, %v3450_v54  ;;  %vm1250_vm15 = vweird.f32 %v3450_v54  ;;  %v2428_v5 = vmul.f32 -1.442695, %v3492_v16 }
 0x118   :  { %v2152_v6 = vmul.f32 %v1723_v34, %v3332_v1  ;;  %v1954_v51 = vadd.f32 %v2650_v21, %v1953_v53  ;;  %2657 = vpow2.f32 %v2475_v61  ;;  %v2444_v10 = vmul.f32 -1.442695, %v3495_v2 }
 0x119   :  { %v1247_v13 = vsub.f32 1.0, %v1246_v3  ;;  %v1256_v43 = vand.u32 2147483648, %v3450_v54  ;;  %2659 = vpow2.f32 %v2428_v5  ;;  %v2460_v44 = vmul.f32 -1.442695, %v3498_v56  ;;  %v536_v23 = vpop.f32.mrf.mxu1 }
 0x11a   :  { %2216 = vst [vmem:[#allocation3 + $0x128] sm:$0xff] %v2152_v6  ;;  %v1958_v50 = vsel %vm1957_vm0, %v2650_v21, %v1954_v51  ;;  %v1254_v17 = vand.u32 2147483647, %v3450_v54  ;;  %2661 = vpow2.f32 %v2444_v10  ;;  %v3515_v1 = vadd.f32 %v3483_v59, %v613_v55 }
 0x11b   :  { %v2654_v19 = vpop.eup %2653  ;;  %v1963_v20 = vsel %vm3473_vm12, %v1962_v52, %v1958_v50  ;;  %v1248_v62 = vmul.f32 %v2652_v12, %v1247_v13  ;;  %vm1251_vm1 = vweird.f32 %v2652_v12  ;;  %2663 = vpow2.f32 %v2460_v44 }
 0x11c   :  { %v2656_v7 = vpop.eup %2655  ;;  %v2168_v46 = vmul.f32 %v1963_v20, %v3336_v41  ;;  %v3520_v8 = vadd.f32 1.0, %v2654_v19  ;;  %v1257_v24 = vor.u32 1.1754944e-38, %v1256_v43  ;;  %vm1252_vm2 = vmor %vm1250_vm15, %vm1251_vm1  ;;  %v2476_v27 = vmul.f32 -1.442695, %v3515_v1 }
 0x11d   :  { %v1249_v11 = vadd.f32 %v2652_v12, %v1248_v62  ;;  %v3522_v30 = vadd.f32 1.0, %v2656_v7  ;;  %v3529_v31 = vadd.f32 %v3483_v59, %v496_v0  ;;  %v3532_v41 = vadd.f32 %v3483_v59, %v536_v23 }
 0x11e   :  { %v2658_v26 = vpop.eup %2657  ;;  %2232 = vst [vmem:[#allocation3 + $0x1a8] sm:$0xff] %v2168_v46  ;;  %2665 = vrcp.f32 %v3520_v8  ;;  %vm1255_vm3 = vcmp.eq.f32.partialorder %v1254_v17, 8.507059e+37  ;;  %v1494_v54 = vand.u32 2147483647, %v3520_v8  ;;  %v1496_v21 = vand.u32 2147483648, %v3520_v8 }
 0x11f   :  { %v2660_v33 = vpop.eup %2659  ;;  %v1253_v4 = vsel %vm1252_vm2, %v2652_v12, %v1249_v11  ;;  %2667 = vrcp.f32 %v3522_v30  ;;  %v3538_v38 = vadd.f32 1.0, %v2658_v26  ;;  %v1734_v40 = vand.u32 2147483647, %v3522_v30 }
 0x120   :  { %v2662_v15 = vpop.eup %2661  ;;  %v1258_v18 = vsel %vm1255_vm3, %v1257_v24, %v1253_v4  ;;  %v3540_v39 = vadd.f32 1.0, %v2660_v33  ;;  %2669 = vpow2.f32 %v2476_v27  ;;  %v2429_v29 = vmul.f32 -1.442695, %v3529_v31 }
 0x121   :  { %v2664_v36 = vpop.eup %2663  ;;  %v2121_v37 = vmul.f32 %v1258_v18, %v3360_v63  ;;  %v2445_v32 = vmul.f32 -1.442695, %v3532_v41  ;;  %vm1490_vm4 = vweird.f32 %v3520_v8  ;;  %2671 = vrcp.f32 %v3538_v38 }
 0x122   :  { %v3547_v45 = vadd.f32 1.0, %v2662_v15  ;;  %v3550_v63 = vadd.f32 %v3483_v59, %v576_v28  ;;  %vm1730_vm5 = vweird.f32 %v3522_v30  ;;  %v1736_v9 = vand.u32 2147483648, %v3522_v30 }
 0x123   :  { %2185 = vst [vmem:[#allocation3 + $0x30] sm:$0xff] %v2121_v37  ;;  %2673 = vrcp.f32 %v3540_v39  ;;  %v3555_v48 = vadd.f32 1.0, %v2664_v36  ;;  %vm3558_vm6 = vcmp.eq.f32.partialorder %v1494_v54, 8.507059e+37  ;;  %v1497_v57 = vor.u32 1.1754944e-38, %v1496_v21 }
 0x124   :  { %v2666_v47 = vpop.eup %2665  ;;  %v1976_v58 = vand.u32 2147483648, %v3538_v38  ;;  %vm3564_vm7 = vcmp.eq.f32.partialorder %v1734_v40, 8.507059e+37  ;;  %v1974_v22 = vand.u32 2147483647, %v3538_v38  ;;  %2675 = vpow2.f32 %v2429_v29 }
 0x125   :  { %v2668_v42 = vpop.eup %2667  ;;  %v1486_v52 = vmul.f32 %v2666_v47, %v3520_v8  ;;  %v1269_v61 = vand.u32 2147483647, %v3540_v39  ;;  %v1271_v34 = vand.u32 2147483648, %v3540_v39  ;;  %2677 = vrcp.f32 %v3547_v45 }
 0x126   :  { %v1726_v35 = vmul.f32 %v2668_v42, %v3522_v30  ;;  %v2670_v3 = vpop.eup %2669  ;;  %v1737_v55 = vor.u32 1.1754944e-38, %v1736_v9  ;;  %vm1970_vm8 = vweird.f32 %v3538_v38  ;;  %2679 = vrcp.f32 %v3555_v48 }
 0x127   :  { %v1487_v53 = vsub.f32 1.0, %v1486_v52  ;;  %v2672_v6 = vpop.eup %2671  ;;  %vm1491_vm9 = vweird.f32 %v2666_v47  ;;  %v1977_v10 = vor.u32 1.1754944e-38, %v1976_v58  ;;  %vm1265_vm10 = vweird.f32 %v3540_v39 }
 0x128   :  { %v1727_v5 = vsub.f32 1.0, %v1726_v35  ;;  %vm1731_vm11 = vweird.f32 %v2668_v42  ;;  %v1966_v44 = vmul.f32 %v2672_v6, %v3538_v38  ;;  %vm3576_vm12 = vcmp.eq.f32.partialorder %v1974_v22, 8.507059e+37  ;;  %vm1492_vm14 = vmor %vm1490_vm4, %vm1491_vm9 }
 0x129   :  { %v1488_v51 = vmul.f32 %v2666_v47, %v1487_v53  ;;  %v2674_v13 = vpop.eup %2673  ;;  %v1509_v17 = vand.u32 2147483647, %v3547_v45  ;;  %vm3582_vm13 = vcmp.eq.f32.partialorder %v1269_v61, 8.507059e+37  ;;  %v1272_v0 = vor.u32 1.1754944e-38, %v1271_v34  ;;  %vm1732_vm2 = vmor %vm1730_vm5, %vm1731_vm11 }
 0x12a   :  { %v1728_v43 = vmul.f32 %v2668_v42, %v1727_v5  ;;  %v1261_v20 = vmul.f32 %v2674_v13, %v3540_v39  ;;  %v1511_v23 = vand.u32 2147483648, %v3547_v45  ;;  %v2676_v7 = vpop.eup %2675  ;;  %v1967_v11 = vsub.f32 1.0, %v1966_v44 }
 0x12b   :  { %v1489_v19 = vadd.f32 %v2666_v47, %v1488_v51  ;;  %vm1971_vm15 = vweird.f32 %v2672_v6  ;;  %vm1266_vm0 = vweird.f32 %v2674_v13  ;;  %vm1505_vm1 = vweird.f32 %v3547_v45  ;;  %v2678_v24 = vpop.eup %2677 }
 0x12c   :  { %v1729_v46 = vadd.f32 %v2668_v42, %v1728_v43  ;;  %v1262_v27 = vsub.f32 1.0, %v1261_v20  ;;  %v3594_v33 = vadd.f32 1.0, %v2670_v3  ;;  %2681 = vpow2.f32 %v2445_v32  ;;  %v2680_v4 = vpop.eup %2679  ;;  %vm1972_vm5 = vmor %vm1970_vm8, %vm1971_vm15 }
 0x12d   :  { %v1493_v26 = vsel %vm1492_vm14, %v2666_v47, %v1489_v19  ;;  %v1968_v18 = vmul.f32 %v2672_v6, %v1967_v11  ;;  %v1501_v54 = vmul.f32 %v2678_v24, %v3547_v45  ;;  %vm3599_vm3 = vcmp.eq.f32.partialorder %v1509_v17, 8.507059e+37 }
 0x12e   :  { %v1498_v8 = vsel %vm3558_vm6, %v1497_v57, %v1493_v26  ;;  %v1733_v15 = vsel %vm1732_vm2, %v2668_v42, %v1729_v46  ;;  %vm1745_vm4 = vweird.f32 %v3555_v48  ;;  %v1263_v37 = vmul.f32 %v2674_v13, %v1262_v27  ;;  %vm1267_vm6 = vmor %vm1265_vm10, %vm1266_vm0  ;;  %v616_v57 = vpop.f32.mrf.mxu3 }
 0x12f   :  { %v2137_v30 = vmul.f32 %v1498_v8, %v3387_v25  ;;  %v1738_v36 = vsel %vm3564_vm7, %v1737_v55, %v1733_v15  ;;  %v3607_v21 = vadd.f32 1.0, %v2676_v7  ;;  %v1969_v29 = vadd.f32 %v2672_v6, %v1968_v18 }
 0x130   :  { %v2153_v40 = vmul.f32 %v1738_v36, %v3393_v14  ;;  %v1502_v32 = vsub.f32 1.0, %v1501_v54  ;;  %v1741_v47 = vmul.f32 %v2680_v4, %v3555_v48  ;;  %v1264_v9 = vadd.f32 %v2674_v13, %v1263_v37 }
 0x131   :  { %2201 = vst [vmem:[#allocation3 + $0xb0] sm:$0xff] %v2137_v30  ;;  %v1749_v25 = vand.u32 2147483647, %v3555_v48  ;;  %v1751_v42 = vand.u32 2147483648, %v3555_v48  ;;  %2683 = vrcp.f32 %v3594_v33  ;;  %v1973_v52 = vsel %vm1972_vm5, %v2672_v6, %v1969_v29 }
 0x132   :  { %2217 = vst [vmem:[#allocation3 + $0x130] sm:$0xff] %v2153_v40  ;;  %v1503_v14 = vmul.f32 %v2678_v24, %v1502_v32  ;;  %vm1506_vm7 = vweird.f32 %v2678_v24  ;;  %v1742_v49 = vsub.f32 1.0, %v1741_v47  ;;  %v2682_v58 = vpop.eup %2681  ;;  %v1978_v38 = vsel %vm3576_vm12, %v1977_v10, %v1973_v52  ;;  %v498_v10 = vpop.f32.mrf.mxu0 }
 0x133   :  { %v1268_v35 = vsel %vm1267_vm6, %v2674_v13, %v1264_v9  ;;  %vm1746_vm8 = vweird.f32 %v2680_v4  ;;  %2685 = vrcp.f32 %v3607_v21  ;;  %v2169_v12 = vmul.f32 %v1978_v38, %v3486_v60  ;;  %vm1507_vm9 = vmor %vm1505_vm1, %vm1506_vm7 }
 0x134   :  { %v1273_v22 = vsel %vm3582_vm13, %v1272_v0, %v1268_v35  ;;  %v1504_v53 = vadd.f32 %v2678_v24, %v1503_v14  ;;  %v1743_v39 = vmul.f32 %v2680_v4, %v1742_v49  ;;  %v1512_v34 = vor.u32 1.1754944e-38, %v1511_v23  ;;  %vm1747_vm11 = vmor %vm1745_vm4, %vm1746_vm8  ;;  %v538_v23 = vpop.f32.mrf.mxu1 }
 0x135   :  { %v2122_v61 = vmul.f32 %v1273_v22, %v3492_v16  ;;  %vm3629_vm10 = vcmp.eq.f32.partialorder %v1749_v25, 8.507059e+37  ;;  %v1989_v5 = vand.u32 2147483647, %v3594_v33  ;;  %2233 = vst [vmem:[#allocation3 + $0x1b0] sm:$0xff] %v2169_v12  ;;  %v1752_v6 = vor.u32 1.1754944e-38, %v1751_v42 }
 0x136   :  { %v1508_v55 = vsel %vm1507_vm9, %v2678_v24, %v1504_v53  ;;  %v1744_v60 = vadd.f32 %v2680_v4, %v1743_v39  ;;  %v1991_v51 = vand.u32 2147483648, %v3594_v33  ;;  %vm1985_vm12 = vweird.f32 %v3594_v33  ;;  %v578_v24 = vpop.f32.mrf.mxu2 }
 0x137   :  { %v2684_v13 = vpop.eup %2683  ;;  %2186 = vst [vmem:[#allocation3 + $0x38] sm:$0xff] %v2122_v61  ;;  %v1513_v16 = vsel %vm3599_vm3, %v1512_v34, %v1508_v55  ;;  %v3641_v45 = vadd.f32 1.0, %v2682_v58  ;;  %v2461_v43 = vmul.f32 -1.442695, %v3550_v63  ;;  %v3647_v19 = vadd.f32 %v3483_v59, %v616_v57 }
 0x138   :  { %v2138_v44 = vmul.f32 %v1513_v16, %v3495_v2  ;;  %v1748_v50 = vsel %vm1747_vm11, %v2680_v4, %v1744_v60  ;;  %v1981_v17 = vmul.f32 %v2684_v13, %v3594_v33  ;;  %vm3651_vm13 = vcmp.eq.f32.partialorder %v1989_v5, 8.507059e+37 }
 0x139   :  { %v2686_v20 = vpop.eup %2685  ;;  %v1753_v62 = vsel %vm3629_vm10, %v1752_v6, %v1748_v50  ;;  %v1284_v0 = vand.u32 2147483647, %v3607_v21  ;;  %2687 = vrcp.f32 %v3641_v45  ;;  %v1992_v46 = vor.u32 1.1754944e-38, %v1991_v51 }
 0x13a   :  { %2202 = vst [vmem:[#allocation3 + $0xb8] sm:$0xff] %v2138_v44  ;;  %v2154_v2 = vmul.f32 %v1753_v62, %v3498_v56  ;;  %v1982_v7 = vsub.f32 1.0, %v1981_v17  ;;  %v1276_v11 = vmul.f32 %v2686_v20, %v3607_v21  ;;  %vm1986_vm14 = vweird.f32 %v2684_v13  ;;  %v618_v56 = vpop.f32.mrf.mxu3  ;;  %v501_v14 = vpop.f32.mrf.mxu0 }
 0x13b   :  { %vm1280_vm15 = vweird.f32 %v3607_v21  ;;  %v1286_v26 = vand.u32 2147483648, %v3607_v21  ;;  %2689 = vpow2.f32 %v2461_v43  ;;  %v2477_v8 = vmul.f32 -1.442695, %v3647_v19  ;;  %vm1987_vm2 = vmor %vm1985_vm12, %vm1986_vm14 }
 0x13c   :  { %2218 = vst [vmem:[#allocation3 + $0x138] sm:$0xff] %v2154_v2  ;;  %v1983_v27 = vmul.f32 %v2684_v13, %v1982_v7  ;;  %v1277_v4 = vsub.f32 1.0, %v1276_v11  ;;  %v3663_v15 = vadd.f32 %v3483_v59, %v498_v10  ;;  %vm1281_vm0 = vweird.f32 %v2686_v20  ;;  %v541_v61 = vpop.f32.mrf.mxu1 }
 0x13d   :  { %vm3665_vm1 = vcmp.eq.f32.partialorder %v1284_v0, 8.507059e+37  ;;  %v3670_v54 = vadd.f32 %v3483_v59, %v538_v23  ;;  %v3673_v28 = vadd.f32 %v3483_v59, %v578_v24  ;;  %2691 = vpow2.f32 %v2477_v8  ;;  %vm1282_vm4 = vmor %vm1280_vm15, %vm1281_vm0 }
 0x13e   :  { %v1984_v30 = vadd.f32 %v2684_v13, %v1983_v27  ;;  %v1278_v36 = vmul.f32 %v2686_v20, %v1277_v4  ;;  %v2430_v37 = vmul.f32 -1.442695, %v3663_v15  ;;  %v1287_v29 = vor.u32 1.1754944e-38, %v1286_v26 }
 0x13f   :  { %v2688_v40 = vpop.eup %2687  ;;  %vm1520_vm3 = vweird.f32 %v3641_v45  ;;  %v2446_v32 = vmul.f32 -1.442695, %v3670_v54  ;;  %v3682_v47 = vadd.f32 %v3483_v59, %v618_v56  ;;  %v1526_v52 = vand.u32 2147483648, %v3641_v45 }
 0x140   :  { %v1988_v9 = vsel %vm1987_vm2, %v2684_v13, %v1984_v30  ;;  %v1279_v25 = vadd.f32 %v2686_v20, %v1278_v36  ;;  %v1516_v42 = vmul.f32 %v2688_v40, %v3641_v45  ;;  %2693 = vpow2.f32 %v2430_v37 }
 0x141   :  { %v2690_v49 = vpop.eup %2689  ;;  %v1993_v33 = vsel %vm3651_vm13, %v1992_v46, %v1988_v9  ;;  %v2462_v57 = vmul.f32 -1.442695, %v3673_v28  ;;  %v2478_v58 = vmul.f32 -1.442695, %v3682_v47  ;;  %v1524_v39 = vand.u32 2147483647, %v3641_v45 }
 0x142   :  { %v2170_v38 = vmul.f32 %v1993_v33, %v3515_v1  ;;  %v1283_v35 = vsel %vm1282_vm4, %v2686_v20, %v1279_v25  ;;  %v1517_v12 = vsub.f32 1.0, %v1516_v42  ;;  %v3694_v22 = vadd.f32 1.0, %v2690_v49  ;;  %v581_v1 = vpop.f32.mrf.mxu2  ;;  %v621_v23 = vpop.f32.mrf.mxu3 }
 0x143   :  { %v1288_v53 = vsel %vm3665_vm1, %v1287_v29, %v1283_v35  ;;  %2695 = vpow2.f32 %v2446_v32  ;;  %v3700_v21 = vadd.f32 %v3483_v59, %v501_v14  ;;  %v2692_v34 = vpop.eup %2691  ;;  %vm1521_vm5 = vweird.f32 %v2688_v40  ;;  %v503_v2 = vpop.f32.mrf.mxu0 }
 0x144   :  { %2234 = vst [vmem:[#allocation3 + $0x1b8] sm:$0xff] %v2170_v38  ;;  %v2123_v3 = vmul.f32 %v1288_v53, %v3529_v31  ;;  %v1518_v5 = vmul.f32 %v2688_v40, %v1517_v12  ;;  %2697 = vrcp.f32 %v3694_v22  ;;  %v3704_v55 = vadd.f32 1.0, %v2692_v34  ;;  %vm1522_vm6 = vmor %vm1520_vm3, %vm1521_vm5 }
 0x145   :  { %2699 = vpow2.f32 %v2462_v57  ;;  %v1527_v6 = vor.u32 1.1754944e-38, %v1526_v52  ;;  %v3707_v51 = vadd.f32 %v3483_v59, %v541_v61  ;;  %v1764_v31 = vand.u32 2147483647, %v3694_v22 }
 0x146   :  { %2187 = vst [vmem:[#allocation3 + $0x40] sm:$0xff] %v2123_v3  ;;  %v1519_v60 = vadd.f32 %v2688_v40, %v1518_v5  ;;  %2701 = vpow2.f32 %v2478_v58  ;;  %v2694_v10 = vpop.eup %2693  ;;  %v1766_v13 = vand.u32 2147483648, %v3694_v22  ;;  %v3715_v16 = vadd.f32 %v3483_v59, %v581_v1 }
 0x147   :  { %2703 = vrcp.f32 %v3704_v55  ;;  %vm1525_vm7 = vcmp.eq.f32.partialorder %v1524_v39, 8.507059e+37  ;;  %v3717_v44 = vadd.f32 1.0, %v2694_v10  ;;  %v2431_v50 = vmul.f32 -1.442695, %v3700_v21 }
 0x148   :  { %v1523_v43 = vsel %vm1522_vm6, %v2688_v40, %v1519_v60  ;;  %vm1760_vm8 = vweird.f32 %v3694_v22  ;;  %v2004_v48 = vand.u32 2147483647, %v3704_v55  ;;  %v2447_v0 = vmul.f32 -1.442695, %v3707_v51 }
 0x149   :  { %v2696_v17 = vpop.eup %2695  ;;  %v1528_v20 = vsel %vm1525_vm7, %v1527_v6, %v1523_v43  ;;  %2705 = vrcp.f32 %v3717_v44  ;;  %vm3726_vm9 = vcmp.eq.f32.partialorder %v1764_v31, 8.507059e+37  ;;  %v1767_v24 = vor.u32 1.1754944e-38, %v1766_v13 }
 0x14a   :  { %v2698_v45 = vpop.eup %2697  ;;  %v2139_v62 = vmul.f32 %v1528_v20, %v3532_v41  ;;  %v2463_v26 = vmul.f32 -1.442695, %v3715_v16  ;;  %vm2000_vm10 = vweird.f32 %v3704_v55  ;;  %v2006_v41 = vand.u32 2147483648, %v3704_v55 }
 0x14b   :  { %v2700_v7 = vpop.eup %2699  ;;  %v1756_v46 = vmul.f32 %v2698_v45, %v3694_v22  ;;  %v3733_v4 = vadd.f32 1.0, %v2696_v17  ;;  %2707 = vpow2.f32 %v2431_v50  ;;  %v1299_v30 = vand.u32 2147483647, %v3717_v44 }
 0x14c   :  { %v2702_v27 = vpop.eup %2701  ;;  %2203 = vst [vmem:[#allocation3 + $0xc0] sm:$0xff] %v2139_v62  ;;  %v3735_v8 = vadd.f32 1.0, %v2700_v7  ;;  %v3739_v36 = vadd.f32 %v3483_v59, %v621_v23  ;;  %v3742_v37 = vadd.f32 %v3483_v59, %v503_v2  ;;  %vm3745_vm11 = vcmp.eq.f32.partialorder %v2004_v48, 8.507059e+37 }
 0x14d   :  { %v2704_v56 = vpop.eup %2703  ;;  %v1757_v18 = vsub.f32 1.0, %v1756_v46  ;;  %v1301_v32 = vand.u32 2147483648, %v3717_v44  ;;  %2709 = vrcp.f32 %v3733_v4  ;;  %vm1761_vm12 = vweird.f32 %v2698_v45 }
 0x14e   :  { %v1996_v40 = vmul.f32 %v2704_v56, %v3704_v55  ;;  %v3751_v25 = vadd.f32 1.0, %v2702_v27  ;;  %2711 = vpow2.f32 %v2447_v0  ;;  %v2007_v14 = vor.u32 1.1754944e-38, %v2006_v41  ;;  %vm1762_vm15 = vmor %vm1760_vm8, %vm1761_vm12 }
 0x14f   :  { %v1758_v9 = vmul.f32 %v2698_v45, %v1757_v18  ;;  %v2706_v42 = vpop.eup %2705  ;;  %vm1295_vm13 = vweird.f32 %v3717_v44  ;;  %2713 = vrcp.f32 %v3735_v8  ;;  %vm3756_vm14 = vcmp.eq.f32.partialorder %v1299_v30, 8.507059e+37 }
 0x150   :  { %v1997_v52 = vsub.f32 1.0, %v1996_v40  ;;  %v1291_v33 = vmul.f32 %v2706_v42, %v3717_v44  ;;  %2715 = vpow2.f32 %v2463_v26  ;;  %vm2001_vm0 = vweird.f32 %v2704_v56 }
 0x151   :  { %v1759_v49 = vadd.f32 %v2698_v45, %v1758_v9  ;;  %v2708_v58 = vpop.eup %2707  ;;  %v1302_v35 = vor.u32 1.1754944e-38, %v1301_v32  ;;  %v1539_v12 = vand.u32 2147483647, %v3733_v4  ;;  %vm1535_vm1 = vweird.f32 %v3733_v4  ;;  %vm2002_vm2 = vmor %vm2000_vm10, %vm2001_vm0 }
 0x152   :  { %v1998_v38 = vmul.f32 %v2704_v56, %v1997_v52  ;;  %v1292_v39 = vsub.f32 1.0, %v1291_v33  ;;  %2717 = vrcp.f32 %v3751_v25  ;;  %v1541_v5 = vand.u32 2147483648, %v3733_v4 }
 0x153   :  { %v1763_v53 = vsel %vm1762_vm15, %v2698_v45, %v1759_v49  ;;  %v2710_v61 = vpop.eup %2709  ;;  %v1779_v22 = vand.u32 2147483647, %v3735_v8  ;;  %vm1296_vm3 = vweird.f32 %v2706_v42  ;;  %vm1775_vm4 = vweird.f32 %v3735_v8 }
 0x154   :  { %v1768_v34 = vsel %vm3726_vm9, %v1767_v24, %v1763_v53  ;;  %v1999_v3 = vadd.f32 %v2704_v56, %v1998_v38  ;;  %v2712_v1 = vpop.eup %2711  ;;  %v1293_v6 = vmul.f32 %v2706_v42, %v1292_v39  ;;  %v1531_v10 = vmul.f32 %v2710_v61, %v3733_v4  ;;  %vm1297_vm6 = vmor %vm1295_vm13, %vm1296_vm3  ;;  %v583_v39 = vpop.f32.mrf.mxu2 }
 0x155   :  { %v2155_v60 = vmul.f32 %v1768_v34, %v3550_v63  ;;  %v2714_v31 = vpop.eup %2713  ;;  %vm3774_vm5 = vcmp.eq.f32.partialorder %v1539_v12, 8.507059e+37  ;;  %v1781_v50 = vand.u32 2147483648, %v3735_v8  ;;  %v3779_v17 = vadd.f32 1.0, %v2708_v58 }
 0x156   :  { %v2003_v13 = vsel %vm2002_vm2, %v2704_v56, %v1999_v3  ;;  %v2716_v63 = vpop.eup %2715  ;;  %v1294_v20 = vadd.f32 %v2706_v42, %v1293_v6  ;;  %v1532_v45 = vsub.f32 1.0, %v1531_v10  ;;  %v1771_v62 = vmul.f32 %v2714_v31, %v3735_v8  ;;  %v543_v8 = vpop.f32.mrf.mxu1 }
 0x157   :  { %2219 = vst [vmem:[#allocation3 + $0x140] sm:$0xff] %v2155_v60  ;;  %v2008_v55 = vsel %vm3745_vm11, %v2007_v14, %v2003_v13  ;;  %v1542_v0 = vor.u32 1.1754944e-38, %v1541_v5  ;;  %vm3788_vm7 = vcmp.eq.f32.partialorder %v1779_v22, 8.507059e+37  ;;  %2719 = vrcp.f32 %v3779_v17  ;;  %v506_v10 = vpop.f32.mrf.mxu0 }
 0x158   :  { %v2171_v48 = vmul.f32 %v2008_v55, %v3647_v19  ;;  %v2718_v2 = vpop.eup %2717  ;;  %v1298_v7 = vsel %vm1297_vm6, %v2706_v42, %v1294_v20  ;;  %v1533_v46 = vmul.f32 %v2710_v61, %v1532_v45  ;;  %vm1536_vm8 = vweird.f32 %v2710_v61 }
 0x159   :  { %v1772_v11 = vsub.f32 1.0, %v1771_v62  ;;  %v1303_v19 = vsel %vm3756_vm14, %v1302_v35, %v1298_v7  ;;  %v1782_v24 = vor.u32 1.1754944e-38, %v1781_v50  ;;  %v2011_v44 = vmul.f32 %v2718_v2, %v3751_v25  ;;  %vm1537_vm10 = vmor %vm1535_vm1, %vm1536_vm8 }
 0x15a   :  { %2235 = vst [vmem:[#allocation3 + $0x1c0] sm:$0xff] %v2171_v48  ;;  %v2019_v26 = vand.u32 2147483647, %v3751_v25  ;;  %v2124_v27 = vmul.f32 %v1303_v19, %v3663_v15  ;;  %v1534_v41 = vadd.f32 %v2710_v61, %v1533_v46  ;;  %vm1776_vm9 = vweird.f32 %v2714_v31 }
 0x15b   :  { %v1773_v56 = vmul.f32 %v2714_v31, %v1772_v11  ;;  %v2012_v18 = vsub.f32 1.0, %v2011_v44  ;;  %vm2016_vm11 = vweird.f32 %v2718_v2  ;;  %v2021_v30 = vand.u32 2147483648, %v3751_v25  ;;  %vm1777_vm12 = vmor %vm1775_vm4, %vm1776_vm9 }
 0x15c   :  { %v3801_v40 = vadd.f32 1.0, %v2712_v1  ;;  %2188 = vst [vmem:[#allocation3 + $0x48] sm:$0xff] %v2124_v27  ;;  %v1538_v29 = vsel %vm1537_vm10, %v2710_v61, %v1534_v41  ;;  %v1314_v9 = vand.u32 2147483647, %v3779_v17  ;;  %v3804_v42 = vadd.f32 1.0, %v2716_v63 }
 0x15d   :  { %v1774_v32 = vadd.f32 %v2714_v31, %v1773_v56  ;;  %v2720_v15 = vpop.eup %2719  ;;  %v1543_v52 = vsel %vm3774_vm5, %v1542_v0, %v1538_v29  ;;  %v2013_v4 = vmul.f32 %v2718_v2, %v2012_v18  ;;  %v1316_v14 = vand.u32 2147483648, %v3779_v17 }
 0x15e   :  { %2721 = vrcp.f32 %v3801_v40  ;;  %v2140_v49 = vmul.f32 %v1543_v52, %v3670_v54  ;;  %v1306_v57 = vmul.f32 %v2720_v15, %v3779_v17  ;;  %v2479_v58 = vmul.f32 -1.442695, %v3739_v36  ;;  %v546_v41 = vpop.f32.mrf.mxu1 }
 0x15f   :  { %v1778_v33 = vsel %vm1777_vm12, %v2714_v31, %v1774_v32  ;;  %v2014_v35 = vadd.f32 %v2718_v2, %v2013_v4  ;;  %vm2015_vm13 = vweird.f32 %v3751_v25  ;;  %vm2020_vm14 = vcmp.eq.f32.partialorder %v2019_v26, 8.507059e+37 }
 0x160   :  { %v1783_v38 = vsel %vm3788_vm7, %v1782_v24, %v1778_v33  ;;  %2204 = vst [vmem:[#allocation3 + $0xc8] sm:$0xff] %v2140_v49  ;;  %vm2017_vm15 = vmor %vm2015_vm13, %vm2016_vm11  ;;  %v2022_v53 = vor.u32 1.1754944e-38, %v2021_v30  ;;  %v1307_v54 = vsub.f32 1.0, %v1306_v57  ;;  %2723 = vrcp.f32 %v3804_v42  ;;  %v586_v30 = vpop.f32.mrf.mxu2 }
 0x161   :  { %v2156_v12 = vmul.f32 %v1783_v38, %v3673_v28  ;;  %v2018_v61 = vsel %vm2017_vm15, %v2718_v2, %v2014_v35  ;;  %vm1310_vm0 = vweird.f32 %v3779_v17  ;;  %vm3822_vm1 = vcmp.eq.f32.partialorder %v1314_v9, 8.507059e+37  ;;  %v623_v28 = vpop.f32.mrf.mxu3 }
 0x162   :  { %v1317_v25 = vor.u32 1.1754944e-38, %v1316_v14  ;;  %v2023_v3 = vsel %vm2020_vm14, %v2022_v53, %v2018_v61  ;;  %v1308_v5 = vmul.f32 %v2720_v15, %v1307_v54  ;;  %vm1311_vm2 = vweird.f32 %v2720_v15 }
 0x163   :  { %2220 = vst [vmem:[#allocation3 + $0x148] sm:$0xff] %v2156_v12  ;;  %2725 = vpow2.f32 %v2479_v58  ;;  %v2172_v1 = vmul.f32 %v2023_v3, %v3682_v47  ;;  %vm1550_vm3 = vweird.f32 %v3801_v40  ;;  %v2432_v60 = vmul.f32 -1.442695, %v3742_v37  ;;  %vm1312_vm4 = vmor %vm1310_vm0, %vm1311_vm2 }
 0x164   :  { %v2722_v22 = vpop.eup %2721  ;;  %v3830_v6 = vadd.f32 %v3483_v59, %v543_v8  ;;  %v1309_v31 = vadd.f32 %v2720_v15, %v1308_v5  ;;  %v1554_v43 = vand.u32 2147483647, %v3801_v40  ;;  %v1556_v50 = vand.u32 2147483648, %v3801_v40 }
 0x165   :  { %v1546_v13 = vmul.f32 %v2722_v22, %v3801_v40  ;;  %2236 = vst [vmem:[#allocation3 + $0x1c8] sm:$0xff] %v2172_v1  ;;  %vm1790_vm5 = vweird.f32 %v3804_v42  ;;  %2727 = vpow2.f32 %v2432_v60  ;;  %v3840_v63 = vadd.f32 %v3483_v59, %v583_v39 }
 0x166   :  { %v2448_v47 = vmul.f32 -1.442695, %v3830_v6  ;;  %v3843_v55 = vadd.f32 %v3483_v59, %v623_v28  ;;  %v2724_v20 = vpop.eup %2723  ;;  %v1313_v45 = vsel %vm1312_vm4, %v2720_v15, %v1309_v31  ;;  %v1796_v48 = vand.u32 2147483648, %v3804_v42 }
 0x167   :  { %v1547_v62 = vsub.f32 1.0, %v1546_v13  ;;  %v3847_v0 = vadd.f32 %v3483_v59, %v506_v10  ;;  %v1318_v17 = vsel %vm3822_vm1, %v1317_v25, %v1313_v45  ;;  %vm1551_vm6 = vweird.f32 %v2722_v22 }
 0x168   :  { %v1786_v23 = vmul.f32 %v2724_v20, %v3804_v42  ;;  %2729 = vpow2.f32 %v2448_v47  ;;  %v2125_v7 = vmul.f32 %v1318_v17, %v3700_v21  ;;  %v2464_v11 = vmul.f32 -1.442695, %v3840_v63  ;;  %vm1552_vm8 = vmor %vm1550_vm3, %vm1551_vm6 }
 0x169   :  { %v2726_v2 = vpop.eup %2725  ;;  %v1548_v46 = vmul.f32 %v2722_v22, %v1547_v62  ;;  %v2480_v19 = vmul.f32 -1.442695, %v3843_v55  ;;  %vm3855_vm7 = vcmp.eq.f32.partialorder %v1554_v43, 8.507059e+37  ;;  %v2433_v27 = vmul.f32 -1.442695, %v3847_v0  ;;  %v626_v57 = vpop.f32.mrf.mxu3 }
 0x16a   :  { %v1787_v44 = vsub.f32 1.0, %v1786_v23  ;;  %v3859_v26 = vadd.f32 1.0, %v2726_v2  ;;  %2189 = vst [vmem:[#allocation3 + $0x50] sm:$0xff] %v2125_v7  ;;  %v1557_v18 = vor.u32 1.1754944e-38, %v1556_v50  ;;  %v1794_v21 = vand.u32 2147483647, %v3804_v42 }
 0x16b   :  { %v1549_v56 = vadd.f32 %v2722_v22, %v1548_v46  ;;  %2731 = vpow2.f32 %v2464_v11  ;;  %v2728_v29 = vpop.eup %2727  ;;  %vm1791_vm9 = vweird.f32 %v2724_v20  ;;  %v1797_v9 = vor.u32 1.1754944e-38, %v1796_v48 }
 0x16c   :  { %v1788_v32 = vmul.f32 %v2724_v20, %v1787_v44  ;;  %2733 = vrcp.f32 %v3859_v26  ;;  %v3867_v52 = vadd.f32 1.0, %v2728_v29  ;;  %v3870_v4 = vadd.f32 %v3483_v59, %v546_v41  ;;  %vm1792_vm10 = vmor %vm1790_vm5, %vm1791_vm9 }
 0x16d   :  { %v1553_v15 = vsel %vm1552_vm8, %v2722_v22, %v1549_v56  ;;  %2735 = vpow2.f32 %v2480_v19  ;;  %v3875_v40 = vadd.f32 %v3483_v59, %v586_v30  ;;  %v2034_v38 = vand.u32 2147483647, %v3859_v26 }
 0x16e   :  { %v2730_v14 = vpop.eup %2729  ;;  %v1558_v49 = vsel %vm3855_vm7, %v1557_v18, %v1553_v15  ;;  %v1789_v33 = vadd.f32 %v2724_v20, %v1788_v32  ;;  %2737 = vpow2.f32 %v2433_v27  ;;  %v2036_v35 = vand.u32 2147483648, %v3859_v26 }
 0x16f   :  { %v2141_v58 = vmul.f32 %v1558_v49, %v3707_v51  ;;  %2739 = vrcp.f32 %v3867_v52  ;;  %vm1795_vm11 = vcmp.eq.f32.partialorder %v1794_v21, 8.507059e+37  ;;  %v3883_v12 = vadd.f32 1.0, %v2730_v14 }
 0x170   :  { %v1793_v8 = vsel %vm1792_vm10, %v2724_v20, %v1789_v33  ;;  %v2449_v39 = vmul.f32 -1.442695, %v3870_v4  ;;  %v3887_v51 = vadd.f32 %v3483_v59, %v626_v57  ;;  %vm2030_vm12 = vweird.f32 %v3859_v26 }
 0x171   :  { %v2732_v53 = vpop.eup %2731  ;;  %2205 = vst [vmem:[#allocation3 + $0xd0] sm:$0xff] %v2141_v58  ;;  %v1798_v54 = vsel %vm1795_vm11, %v1797_v9, %v1793_v8  ;;  %v1329_v34 = vand.u32 2147483647, %v3867_v52  ;;  %2741 = vrcp.f32 %v3883_v12  ;;  %vm3894_vm13 = vcmp.eq.f32.partialorder %v2034_v38, 8.507059e+37 }
 0x172   :  { %v2734_v42 = vpop.eup %2733  ;;  %v2157_v61 = vmul.f32 %v1798_v54, %v3715_v16  ;;  %v2037_v28 = vor.u32 1.1754944e-38, %v2036_v35  ;;  %v2465_v59 = vmul.f32 -1.442695, %v3875_v40  ;;  %vm1325_vm14 = vweird.f32 %v3867_v52 }
 0x173   :  { %v2736_v25 = vpop.eup %2735  ;;  %v2026_v3 = vmul.f32 %v2734_v42, %v3859_v26  ;;  %v1331_v16 = vand.u32 2147483648, %v3867_v52  ;;  %v3901_v1 = vadd.f32 1.0, %v2732_v53  ;;  %v1569_v13 = vand.u32 2147483647, %v3883_v12 }
 0x174   :  { %v2738_v22 = vpop.eup %2737  ;;  %2221 = vst [vmem:[#allocation3 + $0x150] sm:$0xff] %v2157_v61  ;;  %v3903_v60 = vadd.f32 1.0, %v2736_v25  ;;  %2743 = vpow2.f32 %v2449_v39  ;;  %v2481_v43 = vmul.f32 -1.442695, %v3887_v51  ;;  %vm3908_vm15 = vcmp.eq.f32.partialorder %v1329_v34, 8.507059e+37 }
 0x175   :  { %v2740_v10 = vpop.eup %2739  ;;  %v2027_v31 = vsub.f32 1.0, %v2026_v3  ;;  %v1571_v20 = vand.u32 2147483648, %v3883_v12  ;;  %2745 = vrcp.f32 %v3901_v1  ;;  %vm2031_vm0 = vweird.f32 %v2734_v42 }
 0x176   :  { %v1321_v50 = vmul.f32 %v2740_v10, %v3867_v52  ;;  %v3914_v62 = vadd.f32 1.0, %v2738_v22  ;;  %2747 = vpow2.f32 %v2465_v59  ;;  %v1332_v23 = vor.u32 1.1754944e-38, %v1331_v16  ;;  %vm2032_vm3 = vmor %vm2030_vm12, %vm2031_vm0  ;;  %v548_v59 = vpop.f32.mrf.mxu1 }
 0x177   :  { %v2028_v45 = vmul.f32 %v2734_v42, %v2027_v31  ;;  %v2742_v48 = vpop.eup %2741  ;;  %vm1565_vm1 = vweird.f32 %v3883_v12  ;;  %2749 = vrcp.f32 %v3903_v60  ;;  %vm3919_vm2 = vcmp.eq.f32.partialorder %v1569_v13, 8.507059e+37 }
 0x178   :  { %v1322_v17 = vsub.f32 1.0, %v1321_v50  ;;  %v1561_v7 = vmul.f32 %v2742_v48, %v3883_v12  ;;  %v1809_v11 = vand.u32 2147483647, %v3901_v1  ;;  %2751 = vpow2.f32 %v2481_v43 }
 0x179   :  { %v2029_v2 = vadd.f32 %v2734_v42, %v2028_v45  ;;  %vm1326_vm4 = vweird.f32 %v2740_v10  ;;  %v1572_v24 = vor.u32 1.1754944e-38, %v1571_v20  ;;  %v1811_v44 = vand.u32 2147483648, %v3901_v1 }
 0x17a   :  { %v1323_v19 = vmul.f32 %v2740_v10, %v1322_v17  ;;  %v2744_v27 = vpop.eup %2743  ;;  %v1562_v56 = vsub.f32 1.0, %v1561_v7  ;;  %vm1805_vm5 = vweird.f32 %v3901_v1  ;;  %2753 = vrcp.f32 %v3914_v62  ;;  %vm1327_vm7 = vmor %vm1325_vm14, %vm1326_vm4 }
 0x17b   :  { %v2033_v41 = vsel %vm2032_vm3, %v2734_v42, %v2029_v2  ;;  %v2746_v18 = vpop.eup %2745  ;;  %vm1566_vm6 = vweird.f32 %v2742_v48  ;;  %v2049_v26 = vand.u32 2147483647, %v3903_v60  ;;  %vm3937_vm8 = vcmp.eq.f32.partialorder %v1809_v11, 8.507059e+37  ;;  %v508_v42 = vpop.f32.mrf.mxu0  ;;  %v3982_v11 = vld [vmem:[%s4200_s2] ss:$0 sm:$0xff]  ;;  %s2837_s2 = smov [#allocation3]  }
 0x17c   :  { %v2038_v21 = vsel %vm3894_vm13, %v2037_v28, %v2033_v41  ;;  %v1324_v30 = vadd.f32 %v2740_v10, %v1323_v19  ;;  %v2748_v29 = vpop.eup %2747  ;;  %v1563_v9 = vmul.f32 %v2742_v48, %v1562_v56  ;;  %v1801_v15 = vmul.f32 %v2746_v18, %v3901_v1  ;;  %vm1567_vm10 = vmor %vm1565_vm1, %vm1566_vm6  ;;  %s2247_s13 = sshll.u32 %s2837_s2, 4  ;;  %s2248_s13 = int_to_ptr.vmem [resolvable:$true] %s2247_s13 }
 0x17d   :  { %v2173_v32 = vmul.f32 %v2038_v21, %v3739_v36  ;;  %vm2045_vm9 = vweird.f32 %v3903_v60  ;;  %v2750_v49 = vpop.eup %2749  ;;  %v1812_v57 = vor.u32 1.1754944e-38, %v1811_v44  ;;  %v2051_v58 = vand.u32 2147483648, %v3903_v60  ;;  %v628_v44 = vpop.f32.mrf.mxu3 }
 0x17e   :  { %v1328_v33 = vsel %vm1327_vm7, %v2740_v10, %v1324_v30  ;;  %v3943_v38 = vadd.f32 1.0, %v2744_v27  ;;  %v2752_v36 = vpop.eup %2751  ;;  %v1564_v35 = vadd.f32 %v2742_v48, %v1563_v9  ;;  %v1802_v8 = vsub.f32 1.0, %v1801_v15 }
 0x17f   :  { %2237 = vst [vmem:[#allocation3 + $0x1d0] sm:$0xff] %v2173_v32  ;;  %v1333_v52 = vsel %vm3908_vm15, %v1332_v23, %v1328_v33  ;;  %v2041_v53 = vmul.f32 %v2750_v49, %v3903_v60  ;;  %vm3952_vm11 = vcmp.eq.f32.partialorder %v2049_v26, 8.507059e+37  ;;  %vm1340_vm12 = vweird.f32 %v3914_v62 }
 0x180   :  { %v2126_v54 = vmul.f32 %v1333_v52, %v3742_v37  ;;  %2755 = vrcp.f32 %v3943_v38  ;;  %v2754_v61 = vpop.eup %2753  ;;  %v1568_v34 = vsel %vm1567_vm10, %v2742_v48, %v1564_v35  ;;  %v1803_v25 = vmul.f32 %v2746_v18, %v1802_v8 }
 0x181   :  { %vm1806_vm13 = vweird.f32 %v2746_v18  ;;  %v2042_v3 = vsub.f32 1.0, %v2041_v53  ;;  %v1573_v37 = vsel %vm3919_vm2, %v1572_v24, %v1568_v34  ;;  %v2052_v12 = vor.u32 1.1754944e-38, %v2051_v58 }
 0x182   :  { %2190 = vst [vmem:[#allocation3 + $0x58] sm:$0xff] %v2126_v54  ;;  %v1336_v5 = vmul.f32 %v2754_v61, %v3914_v62  ;;  %v1344_v28 = vand.u32 2147483647, %v3914_v62  ;;  %v2142_v22 = vmul.f32 %v1573_v37, %v3830_v6  ;;  %v1804_v16 = vadd.f32 %v2746_v18, %v1803_v25  ;;  %vm1807_vm15 = vmor %vm1805_vm5, %vm1806_vm13  ;;  %v588_v6 = vpop.f32.mrf.mxu2 }
 0x183   :  { %v2043_v10 = vmul.f32 %v2750_v49, %v2042_v3  ;;  %vm2046_vm14 = vweird.f32 %v2750_v49  ;;  %vm1341_vm0 = vweird.f32 %v2754_v61  ;;  %v1346_v13 = vand.u32 2147483648, %v3914_v62  ;;  %v511_v30 = vpop.f32.mrf.mxu0 }
 0x184   :  { %v1337_v31 = vsub.f32 1.0, %v1336_v5  ;;  %v3966_v43 = vadd.f32 1.0, %v2748_v29  ;;  %2206 = vst [vmem:[#allocation3 + $0xd8] sm:$0xff] %v2142_v22  ;;  %v1808_v50 = vsel %vm1807_vm15, %v2746_v18, %v1804_v16  ;;  %v1584_v20 = vand.u32 2147483647, %v3943_v38  ;;  %vm2047_vm1 = vmor %vm2045_vm9, %vm2046_vm14 }
 0x185   :  { %v2044_v47 = vadd.f32 %v2750_v49, %v2043_v10  ;;  %v3969_v45 = vadd.f32 1.0, %v2752_v36  ;;  %v1813_v17 = vsel %vm3937_vm8, %v1812_v57, %v1808_v50  ;;  %v1586_v23 = vand.u32 2147483648, %v3943_v38  ;;  %vm1342_vm3 = vmor %vm1340_vm12, %vm1341_vm0  ;;  %v631_v22 = vpop.f32.mrf.mxu3 }
 0x186   :  { %v2756_v48 = vpop.eup %2755  ;;  %v1338_v1 = vmul.f32 %v2754_v61, %v1337_v31  ;;  %2757 = vrcp.f32 %v3966_v43  ;;  %v2158_v2 = vmul.f32 %v1813_v17, %v3840_v63  ;;  %v3985_v19 = vadd.f32 %v3982_v11, %v508_v42 }
 0x187   :  { %v2048_v7 = vsel %vm2047_vm1, %v2750_v49, %v2044_v47  ;;  %v1576_v46 = vmul.f32 %v2756_v48, %v3943_v38  ;;  %vm1345_vm2 = vcmp.eq.f32.partialorder %v1344_v28, 8.507059e+37  ;;  %v1347_v27 = vor.u32 1.1754944e-38, %v1346_v13  ;;  %v551_v49 = vpop.f32.mrf.mxu1 }
 0x188   :  { %v2053_v60 = vsel %vm3952_vm11, %v2052_v12, %v2048_v7  ;;  %v1339_v24 = vadd.f32 %v2754_v61, %v1338_v1  ;;  %2222 = vst [vmem:[#allocation3 + $0x158] sm:$0xff] %v2158_v2  ;;  %2759 = vrcp.f32 %v3969_v45  ;;  %vm1580_vm4 = vweird.f32 %v3943_v38 }
 0x189   :  { %v2174_v63 = vmul.f32 %v2053_v60, %v3843_v55  ;;  %v1577_v41 = vsub.f32 1.0, %v1576_v46  ;;  %vm3995_vm5 = vcmp.eq.f32.partialorder %v1584_v20, 8.507059e+37  ;;  %v1587_v21 = vor.u32 1.1754944e-38, %v1586_v23 }
 0x18a   :  { %v1343_v56 = vsel %vm1342_vm3, %v2754_v61, %v1339_v24  ;;  %vm1581_vm6 = vweird.f32 %v2756_v48  ;;  %vm1820_vm7 = vweird.f32 %v3966_v43  ;;  %v2434_v62 = vmul.f32 -1.442695, %v3985_v19  ;;  %v591_v38 = vpop.f32.mrf.mxu2 }
 0x18b   :  { %2238 = vst [vmem:[#allocation3 + $0x1d8] sm:$0xff] %v2174_v63  ;;  %v1348_v26 = vsel %vm1345_vm2, %v1347_v27, %v1343_v56  ;;  %v1578_v55 = vmul.f32 %v2756_v48, %v1577_v41  ;;  %v1824_v9 = vand.u32 2147483647, %v3966_v43  ;;  %v4004_v15 = vadd.f32 %v3982_v11, %v548_v59  ;;  %vm1582_vm8 = vmor %vm1580_vm4, %vm1581_vm6  ;;  %v513_v47 = vpop.f32.mrf.mxu0 }
 0x18c   :  { %v2758_v29 = vpop.eup %2757  ;;  %v2127_v32 = vmul.f32 %v1348_v26, %v3847_v0  ;;  %v4007_v14 = vadd.f32 %v3982_v11, %v588_v6  ;;  %v1826_v58 = vand.u32 2147483648, %v3966_v43  ;;  %v2064_v36 = vand.u32 2147483647, %v3969_v45 }
 0x18d   :  { %v1579_v33 = vadd.f32 %v2756_v48, %v1578_v55  ;;  %v1816_v57 = vmul.f32 %v2758_v29, %v3966_v43  ;;  %vm2060_vm9 = vweird.f32 %v3969_v45  ;;  %2761 = vpow2.f32 %v2434_v62 }
 0x18e   :  { %2191 = vst [vmem:[#allocation3 + $0x60] sm:$0xff] %v2127_v32  ;;  %v2450_v0 = vmul.f32 -1.442695, %v4004_v15  ;;  %v2466_v52 = vmul.f32 -1.442695, %v4007_v14  ;;  %v4018_v35 = vadd.f32 %v3982_v11, %v628_v44  ;;  %v2760_v8 = vpop.eup %2759  ;;  %v4021_v39 = vadd.f32 %v3982_v11, %v511_v30 }
 0x18f   :  { %v1583_v53 = vsel %vm1582_vm8, %v2756_v48, %v1579_v33  ;;  %v1817_v54 = vsub.f32 1.0, %v1816_v57  ;;  %v4024_v42 = vadd.f32 %v3982_v11, %v551_v49  ;;  %vm1821_vm10 = vweird.f32 %v2758_v29  ;;  %v553_v60 = vpop.f32.mrf.mxu1 }
 0x190   :  { %v1588_v61 = vsel %vm3995_vm5, %v1587_v21, %v1583_v53  ;;  %v2056_v34 = vmul.f32 %v2760_v8, %v3969_v45  ;;  %2763 = vpow2.f32 %v2450_v0  ;;  %v2482_v37 = vmul.f32 -1.442695, %v4018_v35  ;;  %vm1822_vm11 = vmor %vm1820_vm7, %vm1821_vm10 }
 0x191   :  { %v2143_v25 = vmul.f32 %v1588_v61, %v3870_v4  ;;  %v1818_v3 = vmul.f32 %v2758_v29, %v1817_v54  ;;  %2765 = vpow2.f32 %v2466_v52  ;;  %v2435_v5 = vmul.f32 -1.442695, %v4021_v39 }
 0x192   :  { %v2057_v12 = vsub.f32 1.0, %v2056_v34  ;;  %v2451_v28 = vmul.f32 -1.442695, %v4024_v42  ;;  %v4034_v59 = vadd.f32 %v3982_v11, %v591_v38  ;;  %v1827_v10 = vor.u32 1.1754944e-38, %v1826_v58 }
 0x193   :  { %2207 = vst [vmem:[#allocation3 + $0xe0] sm:$0xff] %v2143_v25  ;;  %v1819_v16 = vadd.f32 %v2758_v29, %v1818_v3  ;;  %v2066_v31 = vand.u32 2147483648, %v3969_v45  ;;  %2767 = vpow2.f32 %v2482_v37  ;;  %v2762_v4 = vpop.eup %2761  ;;  %vm2061_vm12 = vweird.f32 %v2760_v8 }
 0x194   :  { %v2058_v13 = vmul.f32 %v2760_v8, %v2057_v12  ;;  %2769 = vpow2.f32 %v2435_v5  ;;  %v2467_v50 = vmul.f32 -1.442695, %v4034_v59  ;;  %vm1825_vm13 = vcmp.eq.f32.partialorder %v1824_v9, 8.507059e+37  ;;  %vm2062_vm15 = vmor %vm2060_vm9, %vm2061_vm12 }
 0x195   :  { %v1823_v20 = vsel %vm1822_vm11, %v2758_v29, %v1819_v16  ;;  %v4041_v6 = vadd.f32 1.0, %v2762_v4  ;;  %v4044_v48 = vadd.f32 %v3982_v11, %v631_v22  ;;  %vm2065_vm14 = vcmp.eq.f32.partialorder %v2064_v36, 8.507059e+37 }
 0x196   :  { %v2764_v17 = vpop.eup %2763  ;;  %v1828_v1 = vsel %vm1825_vm13, %v1827_v10, %v1823_v20  ;;  %v2059_v23 = vadd.f32 %v2760_v8, %v2058_v13  ;;  %2771 = vpow2.f32 %v2451_v28  ;;  %v2067_v7 = vor.u32 1.1754944e-38, %v2066_v31 }
 0x197   :  { %v2766_v43 = vpop.eup %2765  ;;  %v2159_v2 = vmul.f32 %v1828_v1, %v3875_v40  ;;  %2773 = vrcp.f32 %v4041_v6  ;;  %v4052_v46 = vadd.f32 %v3982_v11, %v513_v47  ;;  %v4054_v44 = vadd.f32 1.0, %v2764_v17 }
 0x198   :  { %v2063_v24 = vsel %vm2062_vm15, %v2760_v8, %v2059_v23  ;;  %v4056_v63 = vadd.f32 1.0, %v2766_v43  ;;  %2775 = vpow2.f32 %v2467_v50  ;;  %v2483_v41 = vmul.f32 -1.442695, %v4044_v48 }
 0x199   :  { %v2768_v27 = vpop.eup %2767  ;;  %2223 = vst [vmem:[#allocation3 + $0x160] sm:$0xff] %v2159_v2  ;;  %v2068_v40 = vsel %vm2065_vm14, %v2067_v7, %v2063_v24  ;;  %v1359_v18 = vand.u32 2147483647, %v4041_v6  ;;  %2777 = vrcp.f32 %v4054_v44  ;;  %v4063_v21 = vadd.f32 %v3982_v11, %v553_v60 }
 0x19a   :  { %v2770_v45 = vpop.eup %2769  ;;  %v2175_v56 = vmul.f32 %v2068_v40, %v3887_v51  ;;  %v1361_v30 = vand.u32 2147483648, %v4041_v6  ;;  %2779 = vrcp.f32 %v4056_v63  ;;  %v4067_v55 = vadd.f32 1.0, %v2768_v27 }
 0x19b   :  { %v4069_v62 = vadd.f32 1.0, %v2770_v45  ;;  %v4072_v29 = vmul.f32 -1.442695, %v4052_v46  ;;  %vm1355_vm0 = vweird.f32 %v4041_v6  ;;  %v1599_v32 = vand.u32 2147483647, %v4054_v44 }
 0x19c   :  { %v2772_v26 = vpop.eup %2771  ;;  %2239 = vst [vmem:[#allocation3 + $0x1e0] sm:$0xff] %v2175_v56  ;;  %v1601_v9 = vand.u32 2147483648, %v4054_v44  ;;  %2781 = vpow2.f32 %v2483_v41  ;;  %vm4078_vm1 = vcmp.eq.f32.partialorder %v1359_v18, 8.507059e+37  ;;  %v1839_v58 = vand.u32 2147483647, %v4056_v63 }
 0x19d   :  { %v2774_v51 = vpop.eup %2773  ;;  %v1841_v36 = vand.u32 2147483648, %v4056_v63  ;;  %v4085_v0 = vmul.f32 -1.442695, %v4063_v21  ;;  %v1362_v52 = vor.u32 1.1754944e-38, %v1361_v30  ;;  %vm1595_vm2 = vweird.f32 %v4054_v44 }
 0x19e   :  { %v2776_v49 = vpop.eup %2775  ;;  %v1351_v33 = vmul.f32 %v2774_v51, %v4041_v6  ;;  %2783 = vrcp.f32 %v4067_v55  ;;  %v4089_v8 = vadd.f32 1.0, %v2772_v26  ;;  %vm1835_vm3 = vweird.f32 %v4056_v63 }
 0x19f   :  { %v2778_v53 = vpop.eup %2777  ;;  %v2081_v38 = vand.u32 2147483648, %v4067_v55  ;;  %2785 = vrcp.f32 %v4069_v62  ;;  %vm1356_vm4 = vweird.f32 %v2774_v51  ;;  %vm4095_vm5 = vcmp.eq.f32.partialorder %v1599_v32, 8.507059e+37 }
 0x1a0   :  { %v1352_v54 = vsub.f32 1.0, %v1351_v33  ;;  %v2780_v61 = vpop.eup %2779  ;;  %v1591_v34 = vmul.f32 %v2778_v53, %v4054_v44  ;;  %v1602_v3 = vor.u32 1.1754944e-38, %v1601_v9  ;;  %v4099_v37 = vadd.f32 1.0, %v2776_v49  ;;  %vm1357_vm10 = vmor %vm1355_vm0, %vm1356_vm4 }
 0x1a1   :  { %v1831_v5 = vmul.f32 %v2780_v61, %v4056_v63  ;;  %vm4102_vm6 = vcmp.eq.f32.partialorder %v1839_v58, 8.507059e+37  ;;  %v1842_v22 = vor.u32 1.1754944e-38, %v1841_v36  ;;  %v2079_v16 = vand.u32 2147483647, %v4067_v55 }
 0x1a2   :  { %v1353_v12 = vmul.f32 %v2774_v51, %v1352_v54  ;;  %v2782_v10 = vpop.eup %2781  ;;  %v1592_v31 = vsub.f32 1.0, %v1591_v34  ;;  %vm1370_vm7 = vweird.f32 %v4069_v62  ;;  %v1374_v4 = vand.u32 2147483647, %v4069_v62 }
 0x1a3   :  { %2787 = vrcp.f32 %v4089_v8  ;;  %vm1596_vm8 = vweird.f32 %v2778_v53  ;;  %v1832_v50 = vsub.f32 1.0, %v1831_v5  ;;  %vm2075_vm9 = vweird.f32 %v4067_v55 }
 0x1a4   :  { %v1354_v13 = vadd.f32 %v2774_v51, %v1353_v12  ;;  %v2082_v47 = vor.u32 1.1754944e-38, %v2081_v38  ;;  %v2784_v20 = vpop.eup %2783  ;;  %v1593_v17 = vmul.f32 %v2778_v53, %v1592_v31  ;;  %vm1836_vm11 = vweird.f32 %v2780_v61  ;;  %vm1597_vm15 = vmor %vm1595_vm2, %vm1596_vm8 }
 0x1a5   :  { %v1376_v1 = vand.u32 2147483648, %v4069_v62  ;;  %2789 = vrcp.f32 %v4099_v37  ;;  %v2786_v23 = vpop.eup %2785  ;;  %v1833_v2 = vmul.f32 %v2780_v61, %v1832_v50  ;;  %v2071_v7 = vmul.f32 %v2784_v20, %v4067_v55  ;;  %vm1837_vm0 = vmor %vm1835_vm3, %vm1836_vm11 }
 0x1a6   :  { %v1358_v43 = vsel %vm1357_vm10, %v2774_v51, %v1354_v13  ;;  %vm4117_vm12 = vcmp.eq.f32.partialorder %v2079_v16, 8.507059e+37  ;;  %vm1610_vm13 = vweird.f32 %v4089_v8  ;;  %v1594_v24 = vadd.f32 %v2778_v53, %v1593_v17 }
 0x1a7   :  { %v1363_v6 = vsel %vm4078_vm1, %v1362_v52, %v1358_v43  ;;  %v1366_v27 = vmul.f32 %v2786_v23, %v4069_v62  ;;  %vm4125_vm14 = vcmp.eq.f32.partialorder %v1374_v4, 8.507059e+37  ;;  %v1614_v41 = vand.u32 2147483647, %v4089_v8  ;;  %v593_v62 = vpop.f32.mrf.mxu2  ;;  %v633_v4 = vpop.f32.mrf.mxu3 }
 0x1a8   :  { %v2128_v45 = vmul.f32 %v1363_v6, %v3985_v19  ;;  %v1834_v56 = vadd.f32 %v2780_v61, %v1833_v2  ;;  %v2072_v18 = vsub.f32 1.0, %v2071_v7  ;;  %v1616_v30 = vand.u32 2147483648, %v4089_v8 }
 0x1a9   :  { %v2788_v26 = vpop.eup %2787  ;;  %v1598_v51 = vsel %vm1597_vm15, %v2778_v53, %v1594_v24  ;;  %vm2076_vm1 = vweird.f32 %v2784_v20  ;;  %v1367_v32 = vsub.f32 1.0, %v1366_v27  ;;  %v1377_v9 = vor.u32 1.1754944e-38, %v1376_v1 }
 0x1aa   :  { %2192 = vst [vmem:[#allocation3 + $0x68] sm:$0xff] %v2128_v45  ;;  %v1603_v19 = vsel %vm4095_vm5, %v1602_v3, %v1598_v51  ;;  %v1838_v49 = vsel %vm1837_vm0, %v2780_v61, %v1834_v56  ;;  %v2073_v44 = vmul.f32 %v2784_v20, %v2072_v18  ;;  %v1606_v33 = vmul.f32 %v2788_v26, %v4089_v8  ;;  %vm2077_vm3 = vmor %vm2075_vm9, %vm2076_vm1 }
 0x1ab   :  { %v2790_v57 = vpop.eup %2789  ;;  %v2144_v58 = vmul.f32 %v1603_v19, %v4004_v15  ;;  %v1843_v36 = vsel %vm4102_vm6, %v1842_v22, %v1838_v49  ;;  %v1368_v52 = vmul.f32 %v2786_v23, %v1367_v32  ;;  %vm1371_vm2 = vweird.f32 %v2786_v23 }
 0x1ac   :  { %v2160_v63 = vmul.f32 %v1843_v36, %v4007_v14  ;;  %v2074_v53 = vadd.f32 %v2784_v20, %v2073_v44  ;;  %v1607_v54 = vsub.f32 1.0, %v1606_v33  ;;  %v1846_v38 = vmul.f32 %v2790_v57, %v4099_v37  ;;  %vm1372_vm6 = vmor %vm1370_vm7, %vm1371_vm2 }
 0x1ad   :  { %2208 = vst [vmem:[#allocation3 + $0xe8] sm:$0xff] %v2144_v58  ;;  %v1369_v61 = vadd.f32 %v2786_v23, %v1368_v52  ;;  %vm1611_vm4 = vweird.f32 %v2788_v26  ;;  %vm1851_vm5 = vweird.f32 %v2790_v57  ;;  %v1854_v15 = vand.u32 2147483647, %v4099_v37 }
 0x1ae   :  { %2224 = vst [vmem:[#allocation3 + $0x168] sm:$0xff] %v2160_v63  ;;  %v2078_v34 = vsel %vm2077_vm3, %v2784_v20, %v2074_v53  ;;  %v1608_v14 = vmul.f32 %v2788_v26, %v1607_v54  ;;  %v1847_v25 = vsub.f32 1.0, %v1846_v38  ;;  %v1153_v3 = vadd.f32 1.0, %v2782_v10  ;;  %vm1612_vm7 = vmor %vm1610_vm13, %vm1611_vm4 }
 0x1af   :  { %v2083_v12 = vsel %vm4117_vm12, %v2082_v47, %v2078_v34  ;;  %v1373_v5 = vsel %vm1372_vm6, %v2786_v23, %v1369_v61  ;;  %v1856_v55 = vand.u32 2147483648, %v4099_v37  ;;  %2791 = vpow2.f32 %v4072_v29 }
 0x1b0   :  { %v2176_v28 = vmul.f32 %v2083_v12, %v4018_v35  ;;  %v1378_v22 = vsel %vm4125_vm14, %v1377_v9, %v1373_v5  ;;  %v1609_v16 = vadd.f32 %v2788_v26, %v1608_v14  ;;  %v1848_v31 = vmul.f32 %v2790_v57, %v1847_v25 }
 0x1b1   :  { %v2129_v13 = vmul.f32 %v1378_v22, %v4021_v39  ;;  %v1617_v10 = vor.u32 1.1754944e-38, %v1616_v30  ;;  %vm1850_vm8 = vweird.f32 %v4099_v37  ;;  %2793 = vrcp.f32 %v1153_v3 }
 0x1b2   :  { %2240 = vst [vmem:[#allocation3 + $0x1e8] sm:$0xff] %v2176_v28  ;;  %v1613_v29 = vsel %vm1612_vm7, %v2788_v26, %v1609_v16  ;;  %vm1615_vm9 = vcmp.eq.f32.partialorder %v1614_v41, 8.507059e+37  ;;  %v1849_v35 = vadd.f32 %v2790_v57, %v1848_v31  ;;  %2795 = vpow2.f32 %v4085_v0  ;;  %vm1852_vm10 = vmor %vm1850_vm8, %vm1851_vm5 }
 0x1b3   :  { %2193 = vst [vmem:[#allocation3 + $0x70] sm:$0xff] %v2129_v13  ;;  %v1618_v50 = vsel %vm1615_vm9, %v1617_v10, %v1613_v29  ;;  %v1857_v47 = vor.u32 1.1754944e-38, %v1856_v55  ;;  %v4167_v39 = vadd.f32 %v3982_v11, %v593_v62  ;;  %v4170_v8 = vadd.f32 %v3982_v11, %v633_v4 }
 0x1b4   :  { %v2145_v37 = vmul.f32 %v1618_v50, %v4024_v42  ;;  %v1853_v20 = vsel %vm1852_vm10, %v2790_v57, %v1849_v35  ;;  %vm1855_vm11 = vcmp.eq.f32.partialorder %v1854_v15, 8.507059e+37  ;;  %v2096_v24 = vand.u32 2147483648, %v1153_v3 }
 0x1b5   :  { %v2792_v17 = vpop.eup %2791  ;;  %v1858_v1 = vsel %vm1855_vm11, %v1857_v47, %v1853_v20  ;;  %v2468_v23 = vmul.f32 -1.442695, %v4167_v39  ;;  %v2484_v0 = vmul.f32 -1.442695, %v4170_v8  ;;  %v2094_v40 = vand.u32 2147483647, %v1153_v3 }
 0x1b6   :  { %2209 = vst [vmem:[#allocation3 + $0xf0] sm:$0xff] %v2145_v37  ;;  %v2161_v43 = vmul.f32 %v1858_v1, %v4034_v59  ;;  %v1106_v2 = vadd.f32 1.0, %v2792_v17  ;;  %vm2090_vm13 = vweird.f32 %v1153_v3  ;;  %v2097_v30 = vor.u32 1.1754944e-38, %v2096_v24 }
 0x1b7   :  { %v2794_v7 = vpop.eup %2793  ;;  %2797 = vpow2.f32 %v2468_v23  ;;  %vm2095_vm15 = vcmp.eq.f32.partialorder %v2094_v40, 8.507059e+37 }
 0x1b8   :  { %v2796_v60 = vpop.eup %2795  ;;  %2225 = vst [vmem:[#allocation3 + $0x170] sm:$0xff] %v2161_v43  ;;  %v2086_v11 = vmul.f32 %v2794_v7, %v1153_v3  ;;  %2799 = vrcp.f32 %v1106_v2  ;;  %vm2091_vm12 = vweird.f32 %v2794_v7  ;;  %v1391_v33 = vand.u32 2147483648, %v1106_v2 }
 0x1b9   :  { %v1122_v6 = vadd.f32 1.0, %v2796_v60  ;;  %2801 = vpow2.f32 %v2484_v0  ;;  %vm2092_vm14 = vmor %vm2090_vm13, %vm2091_vm12  ;;  %v1389_v36 = vand.u32 2147483647, %v1106_v2  ;;  %vm1385_vm1 = vweird.f32 %v1106_v2 }
 0x1ba   :  { %v2087_v42 = vsub.f32 1.0, %v2086_v11  ;;  %v1392_v38 = vor.u32 1.1754944e-38, %v1391_v33 }
 0x1bb   :  { %2803 = vrcp.f32 %v1122_v6  ;;  %v1631_v53 = vand.u32 2147483648, %v1122_v6  ;;  %v1629_v15 = vand.u32 2147483647, %v1122_v6  ;;  %vm1390_vm4 = vcmp.eq.f32.partialorder %v1389_v36, 8.507059e+37 }
 0x1bc   :  { %v2088_v27 = vmul.f32 %v2794_v7, %v2087_v42  ;;  %vm1625_vm5 = vweird.f32 %v1122_v6 }
 0x1bd   :  { %v2798_v41 = vpop.eup %2797  ;;  %v1632_v5 = vor.u32 1.1754944e-38, %v1631_v53  ;;  %vm1630_vm7 = vcmp.eq.f32.partialorder %v1629_v15, 8.507059e+37 }
 0x1be   :  { %v2800_v45 = vpop.eup %2799  ;;  %v2089_v56 = vadd.f32 %v2794_v7, %v2088_v27  ;;  %v4176_v59 = vadd.f32 1.0, %v2798_v41 }
 0x1bf   :  { %v2802_v18 = vpop.eup %2801  ;;  %v1381_v26 = vmul.f32 %v2800_v45, %v1106_v2  ;;  %vm1386_vm0 = vweird.f32 %v2800_v45 }
 0x1c0   :  { %v2093_v51 = vsel %vm2092_vm14, %v2794_v7, %v2089_v56  ;;  %2805 = vrcp.f32 %v4176_v59  ;;  %v4179_v49 = vadd.f32 1.0, %v2802_v18  ;;  %vm1387_vm2 = vmor %vm1385_vm1, %vm1386_vm0  ;;  %v1871_v22 = vand.u32 2147483648, %v4176_v59 }
 0x1c1   :  { %v2804_v32 = vpop.eup %2803  ;;  %v2098_v9 = vsel %vm2095_vm15, %v2097_v30, %v2093_v51  ;;  %v1382_v19 = vsub.f32 1.0, %v1381_v26  ;;  %v1869_v4 = vand.u32 2147483647, %v4176_v59  ;;  %vm1865_vm9 = vweird.f32 %v4176_v59 }
 0x1c2   :  { %v2177_v44 = vmul.f32 %v2098_v9, %v4044_v48  ;;  %v1621_v57 = vmul.f32 %v2804_v32, %v1122_v6  ;;  %2807 = vrcp.f32 %v4179_v49  ;;  %vm1626_vm3 = vweird.f32 %v2804_v32 }
 0x1c3   :  { %v1383_v58 = vmul.f32 %v2800_v45, %v1382_v19  ;;  %vm1627_vm6 = vmor %vm1625_vm5, %vm1626_vm3  ;;  %v1872_v35 = vor.u32 1.1754944e-38, %v1871_v22  ;;  %v2109_v47 = vand.u32 2147483647, %v4179_v49  ;;  %vm1870_vm12 = vcmp.eq.f32.partialorder %v1869_v4, 8.507059e+37 }
 0x1c4   :  { %2241 = vst [vmem:[#allocation3 + $0x1f0] sm:$0xff] %v2177_v44  ;;  %v1622_v52 = vsub.f32 1.0, %v1621_v57  ;;  %vm2105_vm13 = vweird.f32 %v4179_v49 }
 0x1c5   :  { %v1384_v63 = vadd.f32 %v2800_v45, %v1383_v58  ;;  %vm2110_vm15 = vcmp.eq.f32.partialorder %v2109_v47, 8.507059e+37 }
 0x1c6   :  { %v2806_v54 = vpop.eup %2805  ;;  %v1623_v61 = vmul.f32 %v2804_v32, %v1622_v52 }
 0x1c7   :  { %v1388_v34 = vsel %vm1387_vm2, %v2800_v45, %v1384_v63  ;;  %v1861_v48 = vmul.f32 %v2806_v54, %v4176_v59  ;;  %vm1866_vm8 = vweird.f32 %v2806_v54 }
 0x1c8   :  { %v1393_v14 = vsel %vm1390_vm4, %v1392_v38, %v1388_v34  ;;  %v1624_v25 = vadd.f32 %v2804_v32, %v1623_v61  ;;  %v2808_v3 = vpop.eup %2807  ;;  %vm1867_vm10 = vmor %vm1865_vm9, %vm1866_vm8 }
 0x1c9   :  { %v2130_v12 = vmul.f32 %v1393_v14, %v4052_v46  ;;  %v1862_v55 = vsub.f32 1.0, %v1861_v48  ;;  %v2101_v16 = vmul.f32 %v2808_v3, %v4179_v49  ;;  %v2111_v46 = vand.u32 2147483648, %v4179_v49 }
 0x1ca   :  { %v1628_v28 = vsel %vm1627_vm6, %v2804_v32, %v1624_v25  ;;  %vm2106_vm11 = vweird.f32 %v2808_v3 }
 0x1cb   :  { %2194 = vst [vmem:[#allocation3 + $0x78] sm:$0xff] %v2130_v12  ;;  %v1633_v31 = vsel %vm1630_vm7, %v1632_v5, %v1628_v28  ;;  %v1863_v62 = vmul.f32 %v2806_v54, %v1862_v55  ;;  %v2102_v10 = vsub.f32 1.0, %v2101_v16  ;;  %vm2107_vm14 = vmor %vm2105_vm13, %vm2106_vm11  ;;  %v2112_v1 = vor.u32 1.1754944e-38, %v2111_v46 }
 0x1cc   :  { %v2146_v13 = vmul.f32 %v1633_v31, %v4063_v21 }
 0x1cd   :  { %v1864_v29 = vadd.f32 %v2806_v54, %v1863_v62  ;;  %v2103_v50 = vmul.f32 %v2808_v3, %v2102_v10 }
 0x1ce   :  { %2210 = vst [vmem:[#allocation3 + $0xf8] sm:$0xff] %v2146_v13 }
 0x1cf   :  { %v1868_v37 = vsel %vm1867_vm10, %v2806_v54, %v1864_v29  ;;  %v2104_v17 = vadd.f32 %v2808_v3, %v2103_v50 }
 0x1d0   :  { %v1873_v20 = vsel %vm1870_vm12, %v1872_v35, %v1868_v37 }
 0x1d1   :  { %v2162_v21 = vmul.f32 %v1873_v20, %v4167_v39  ;;  %v2108_v23 = vsel %vm2107_vm14, %v2808_v3, %v2104_v17 }
 0x1d2   :  { %v2113_v0 = vsel %vm2110_vm15, %v2112_v1, %v2108_v23 }
 0x1d3   :  { %2226 = vst [vmem:[#allocation3 + $0x178] sm:$0xff] %v2162_v21  ;;  %v2178_v43 = vmul.f32 %v2113_v0, %v4170_v8 }
 0x1d5   :  { %2242 = vst [vmem:[#allocation3 + $0x1f8] sm:$0xff] %v2178_v43 }
 0x1d6   :  { %2255 = dma.vmem_to_hbm [thread:$0]  %s2248_s13, 8192, %s2250_s16, [#allocation4], %s2838_s17, %s2838_s17, %s2839_s18  }
 0x1d7   :  { %2835 = dma.done.wait [#allocation4], 8192  }
 0x1d8   :  { %2836 = vsyncadd [#allocation4], 4294959104 }
 0x1d9   :  { %2260 = vsyncpa [#allocation4], 1 }

</bundles_post_ra>
